<compile_context>
chip_gen: v5e
topology: v5e:2x2
jax: 0.10.0
libtpu: 0.0.40
codegen_flags: <defaults>
</compile_context>

<pallas_src>
import functools

import jax
import jax.numpy as jnp
from jax.experimental import pallas as pl
from jax.experimental.pallas import tpu as pltpu


def _rdb_conv_kernel(xt_ref, w_ref, b_ref, out_ref, *, tile_h, W, Cin, G, K):
    """One grid step handles one halo'd row tile of one batch element.

    xt_ref : (1, 1, tile_h + 2p, W + 2p, Cin)  zero-padded input tile (VMEM)
    w_ref  : (K*K*Cin, G)                      flattened conv weights (VMEM, resident)
    b_ref  : (1, G)                            conv bias (VMEM, resident)
    out_ref: (1, tile_h, W, Cin + G)           concat([x, relu(conv(x))], channel)
    """
    pad = (K - 1) // 2
    x = xt_ref[0, 0]  # (tile_h + 2*pad, W + 2*pad, Cin)

    # im2col: fuse the K*K taps on the channel (lane) axis -> a single MXU
    # contraction of width K*K*Cin instead of K*K matmuls of width Cin.
    taps = [x[kh:kh + tile_h, kw:kw + W, :] for kh in range(K) for kw in range(K)]

    # Pass-through copy of x into the low output channels: reuse the centre tap,
    # direct slice store (no in-kernel concatenate of x with the conv result).
    out_ref[0, :, :, 0:Cin] = taps[pad * K + pad].astype(out_ref.dtype)

    patches = jnp.concatenate(taps, axis=-1)             # (tile_h, W, K*K*Cin)
    patches = patches.reshape(tile_h * W, K * K * Cin)   # one fat matmul LHS

    acc = jnp.dot(patches, w_ref[...], preferred_element_type=jnp.float32)
    acc = acc + b_ref[0].astype(jnp.float32)[None, :]
    conv_relu = jnp.maximum(acc, 0.0).reshape(tile_h, W, G)

    out_ref[0, :, :, Cin:Cin + G] = conv_relu.astype(out_ref.dtype)


def _choose_tile_h(H, W, Cin, G, K, itemsize, vmem_budget=20 * 1024 * 1024):
    """Largest row tile whose blocks fit the VMEM budget; prefer divisors of H."""
    pad = (K - 1) // 2

    def kernel_bytes(th):
        in_blk = (th + 2 * pad) * (W + 2 * pad) * Cin * itemsize
        out_blk = th * W * (Cin + G) * itemsize
        patches = th * W * K * K * Cin * 4   # im2col buffer (f32)
        acc = th * W * G * 4                 # f32 accumulator
        return 2 * (in_blk + out_blk) + patches + acc   # x2 = double buffering

    th = min(H, 256)
    while th > 8 and kernel_bytes(th) > vmem_budget:
        th -= 8
    th = max(1, min(th, H))
    # Prefer an exact divisor of H (no padded rows, no post-kernel slice copy),
    # as long as it does not shrink the tile by more than ~2x.
    if H % th != 0:
        for cand in range(th, max(th // 2, 1) - 1, -1):
            if H % cand == 0:
                return cand
    return th


def rdb_conv_forward_nhwc(x_nhwc, w_flat, bias, *, k_size=3, tile_h=None):
    """NHWC forward. x_nhwc: (N,H,W,Cin); w_flat: (K*K*Cin, G); bias: (G,)."""
    N, H, W, Cin = x_nhwc.shape
    K = k_size
    assert K % 2 == 1, "RDB_Conv assumes odd kSize (same padding)"
    KKC, G = w_flat.shape
    assert KKC == K * K * Cin
    pad = (K - 1) // 2

    if tile_h is None:
        tile_h = _choose_tile_h(H, W, Cin, G, K, jnp.dtype(x_nhwc.dtype).itemsize)
    tile_h = max(1, min(tile_h, H))
    n_th = -(-H // tile_h)          # ceil(H / tile_h)
    H_pad = n_th * tile_h

    # Zero pad: conv halo + bottom rows up to a multiple of tile_h.
    x_p = jnp.pad(x_nhwc, ((0, 0), (pad, pad + (H_pad - H)), (pad, pad), (0, 0)))

    # Halo'd non-overlapping row tiles: (N, n_th, tile_h+2p, W+2p, Cin).
    # For n_th == 1 (common patch-training case) this is a pure reshape (no copy);
    # for n_th > 1 the extra HBM write (~1x input) buys bounded VMEM per step.
    x_tiles = jnp.stack(
        [x_p[:, t * tile_h: t * tile_h + tile_h + 2 * pad] for t in range(n_th)],
        axis=1,
    )

    b_2d = bias.reshape(1, G)

    kernel = functools.partial(
        _rdb_conv_kernel, tile_h=tile_h, W=W, Cin=Cin, G=G, K=K)

    out = pl.pallas_call(
        kernel,
        out_shape=jax.ShapeDtypeStruct((N, H_pad, W, Cin + G), x_nhwc.dtype),
        grid_spec=pltpu.PrefetchScalarGridSpec(
            num_scalar_prefetch=0,
            grid=(N, n_th),
            in_specs=[
                pl.BlockSpec((1, 1, tile_h + 2 * pad, W + 2 * pad, Cin),
                             lambda n, t: (n, t, 0, 0, 0)),
                pl.BlockSpec((K * K * Cin, G), lambda n, t: (0, 0)),
                pl.BlockSpec((1, G), lambda n, t: (0, 0)),
            ],
            out_specs=pl.BlockSpec((1, tile_h, W, Cin + G),
                                   lambda n, t: (n, t, 0, 0)),
        ),
        compiler_params=pltpu.CompilerParams(
            dimension_semantics=("parallel", "parallel"),
            vmem_limit_bytes=32 * 1024 * 1024,
        ),
    )(x_tiles, w_flat, b_2d)

    return out[:, :H] if H_pad != H else out


def rdb_conv_forward(x_nchw, weight, bias, k_size=3, tile_h=None):
    """PyTorch-layout forward: x (N,Cin,H,W), weight (G,Cin,K,K), bias (G,)."""
    N, Cin, H, W = x_nchw.shape
    K = k_size
    # Layout plumbing only needed because the module is NCHW; a full NHWC RDN
    # pipeline should call rdb_conv_forward_nhwc directly (saves 2 HBM passes).
    x_nhwc = jnp.transpose(x_nchw, (0, 2, 3, 1))                          # (N,H,W,Cin)
    w_flat = jnp.transpose(weight, (2, 3, 1, 0)).reshape(K * K * Cin, -1)  # (KKC, G)
    out_nhwc = rdb_conv_forward_nhwc(x_nhwc, w_flat, bias, k_size=K, tile_h=tile_h)
    return jnp.transpose(out_nhwc, (0, 3, 1, 2))                          # (N,Cin+G,H,W)


def _reference(x_nchw, weight, bias, k_size=3):
    """Pure-JAX reference (matches PyTorch semantics) for a sanity check."""
    pad = (k_size - 1) // 2
    out = jax.lax.conv_general_dilated(
        x_nchw, weight,
        window_strides=(1, 1),
        padding=((pad, pad), (pad, pad)),
        dimension_numbers=("NCHW", "OIHW", "NCHW"),
    ) + bias.reshape(1, -1, 1, 1)
    out = jnp.maximum(out, 0.0)
    return jnp.concatenate([x_nchw, out], axis=1)


if __name__ == "__main__":
    # Small shapes consistent with the module: N=2, Cin=4, H=W=16, growRate G=8.
    N, Cin, H, W = 2, 4, 16, 16
    G, K = 8, 3

    key = jax.random.PRNGKey(0)
    kx, kw, kb = jax.random.split(key, 3)
    x = jax.random.normal(kx, (N, Cin, H, W), dtype=jnp.float32)
    weight = 0.1 * jax.random.normal(kw, (G, Cin, K, K), dtype=jnp.float32)
    bias = 0.05 * jax.random.normal(kb, (G,), dtype=jnp.float32)

    ref = _reference(x, weight, bias, k_size=K)

    # Adaptive tile (here: tile_h == H, grid (N, 1)).
    fwd_auto = jax.jit(functools.partial(rdb_conv_forward, k_size=K, tile_h=None))
    out_auto = jax.block_until_ready(fwd_auto(x, weight, bias))
    assert out_auto.shape == (N, Cin + G, H, W)
    assert jnp.allclose(out_auto, ref, atol=1e-4, rtol=1e-4)

    # Explicit tile_h=8 exercises the multi-row-tile grid axis (grid (N, 2)).
    fwd_tiled = jax.jit(functools.partial(rdb_conv_forward, k_size=K, tile_h=8))
    out_tiled = jax.block_until_ready(fwd_tiled(x, weight, bias))
    assert out_tiled.shape == (N, Cin + G, H, W)
    assert jnp.allclose(out_tiled, ref, atol=1e-4, rtol=1e-4)

    print("KERNEL_OK")
</pallas_src>

<mosaic_0001>
module attributes {stable_mosaic.version = 11 : i64} {
  func.func @_rdb_conv_kernel(%arg0: i32, %arg1: i32, %arg2: memref<1x1x18x18x4xf32, #tpu.memory_space<vmem>>, %arg3: memref<36x8xf32, #tpu.memory_space<vmem>>, %arg4: memref<1x8xf32, #tpu.memory_space<vmem>>, %arg5: memref<1x16x16x12xf32, #tpu.memory_space<vmem>>) attributes {dimension_semantics = [#tpu.dimension_semantics<parallel>, #tpu.dimension_semantics<parallel>], iteration_bounds = array<i64: 2, 1>, scalar_prefetch = 0 : i64, scratch_operands = 0 : i64, tpu.core_type = #tpu.core_type<tc>, window_params = [{transform_indices = @transform_0, window_bounds = array<i64: 1, 1, 18, 18, 4>}, {pipeline_mode = #tpu.pipeline_mode<synchronous>, transform_indices = @transform_1, window_bounds = array<i64: 36, 8>}, {pipeline_mode = #tpu.pipeline_mode<synchronous>, transform_indices = @transform_2, window_bounds = array<i64: 1, 8>}, {transform_indices = @transform_3, window_bounds = array<i64: 1, 16, 16, 12>}]} {
    %c0 = arith.constant 0 : index
    %c0_0 = arith.constant 0 : index
    %c0_1 = arith.constant 0 : index
    %c0_2 = arith.constant 0 : index
    %c0_3 = arith.constant 0 : index
    %0 = vector.load %arg2[%c0, %c0_0, %c0_1, %c0_2, %c0_3] : memref<1x1x18x18x4xf32, #tpu.memory_space<vmem>>, vector<1x1x18x18x4xf32>
    %1 = vector.shape_cast %0 : vector<1x1x18x18x4xf32> to vector<18x18x4xf32>
    %2 = vector.extract_strided_slice %1 {offsets = [0, 0, 0], sizes = [16, 16, 4], strides = [1, 1, 1]} : vector<18x18x4xf32> to vector<16x16x4xf32>
    %3 = vector.extract_strided_slice %1 {offsets = [0, 1, 0], sizes = [16, 16, 4], strides = [1, 1, 1]} : vector<18x18x4xf32> to vector<16x16x4xf32>
    %4 = vector.extract_strided_slice %1 {offsets = [0, 2, 0], sizes = [16, 16, 4], strides = [1, 1, 1]} : vector<18x18x4xf32> to vector<16x16x4xf32>
    %5 = vector.extract_strided_slice %1 {offsets = [1, 0, 0], sizes = [16, 16, 4], strides = [1, 1, 1]} : vector<18x18x4xf32> to vector<16x16x4xf32>
    %6 = vector.extract_strided_slice %1 {offsets = [1, 1, 0], sizes = [16, 16, 4], strides = [1, 1, 1]} : vector<18x18x4xf32> to vector<16x16x4xf32>
    %7 = vector.extract_strided_slice %1 {offsets = [1, 2, 0], sizes = [16, 16, 4], strides = [1, 1, 1]} : vector<18x18x4xf32> to vector<16x16x4xf32>
    %8 = vector.extract_strided_slice %1 {offsets = [2, 0, 0], sizes = [16, 16, 4], strides = [1, 1, 1]} : vector<18x18x4xf32> to vector<16x16x4xf32>
    %9 = vector.extract_strided_slice %1 {offsets = [2, 1, 0], sizes = [16, 16, 4], strides = [1, 1, 1]} : vector<18x18x4xf32> to vector<16x16x4xf32>
    %10 = vector.extract_strided_slice %1 {offsets = [2, 2, 0], sizes = [16, 16, 4], strides = [1, 1, 1]} : vector<18x18x4xf32> to vector<16x16x4xf32>
    %c0_4 = arith.constant 0 : index
    %c0_5 = arith.constant 0 : index
    %c0_6 = arith.constant 0 : index
    %c0_7 = arith.constant 0 : index
    %11 = vector.load %arg5[%c0_4, %c0_5, %c0_6, %c0_7] : memref<1x16x16x12xf32, #tpu.memory_space<vmem>>, vector<1x16x16x4xf32>
    %12 = vector.shape_cast %11 : vector<1x16x16x4xf32> to vector<16x16x4xf32>
    %13 = vector.shape_cast %6 : vector<16x16x4xf32> to vector<1x16x16x4xf32>
    tpu.vector_store %arg5[%c0_4, %c0_5, %c0_6, %c0_7], %13 {strides = array<i32>} : memref<1x16x16x12xf32, #tpu.memory_space<vmem>>, vector<1x16x16x4xf32>,
    %14 = tpu.concatenate %2, %3, %4, %5, %6, %7, %8, %9, %10 in 2 : vector<16x16x4xf32>, vector<16x16x4xf32>, vector<16x16x4xf32>, vector<16x16x4xf32>, vector<16x16x4xf32>, vector<16x16x4xf32>, vector<16x16x4xf32>, vector<16x16x4xf32>, vector<16x16x4xf32> -> vector<16x16x36xf32>
    %15 = vector.shape_cast %14 : vector<16x16x36xf32> to vector<256x36xf32>
    %c0_8 = arith.constant 0 : index
    %c0_9 = arith.constant 0 : index
    %16 = vector.load %arg3[%c0_8, %c0_9] : memref<36x8xf32, #tpu.memory_space<vmem>>, vector<36x8xf32>
    %cst = arith.constant dense<0.000000e+00> : vector<256x8xf32>
    %17 = tpu.matmul %15, %16, %cst {dimension_numbers = #tpu.dot_dimension_numbers<[1], [0], [0], [1], [0, 0, 1, 1], [], []>} : vector<256x36xf32>, vector<36x8xf32>, vector<256x8xf32> -> vector<256x8xf32>
    %c0_10 = arith.constant 0 : index
    %c0_11 = arith.constant 0 : index
    %18 = vector.load %arg4[%c0_10, %c0_11] : memref<1x8xf32, #tpu.memory_space<vmem>>, vector<1x8xf32>
    %19 = vector.shape_cast %18 : vector<1x8xf32> to vector<8xf32>
    %20 = vector.shape_cast %19 : vector<8xf32> to vector<1x8xf32>
    %21 = vector.broadcast %20 : vector<1x8xf32> to vector<256x8xf32>
    %22 = arith.addf %17, %21 : vector<256x8xf32>
    %cst_12 = arith.constant 0.000000e+00 : f32
    %23 = vector.broadcast %cst_12 : f32 to vector<256x8xf32>
    %24 = arith.maximumf %22, %23 : vector<256x8xf32>
    %25 = vector.shape_cast %24 : vector<256x8xf32> to vector<16x16x8xf32>
    %c0_13 = arith.constant 0 : index
    %c0_14 = arith.constant 0 : index
    %c0_15 = arith.constant 0 : index
    %c4 = arith.constant 4 : index
    %26 = vector.load %arg5[%c0_13, %c0_14, %c0_15, %c4] : memref<1x16x16x12xf32, #tpu.memory_space<vmem>>, vector<1x16x16x8xf32>
    %27 = vector.shape_cast %26 : vector<1x16x16x8xf32> to vector<16x16x8xf32>
    %28 = vector.shape_cast %25 : vector<16x16x8xf32> to vector<1x16x16x8xf32>
    tpu.vector_store %arg5[%c0_13, %c0_14, %c0_15, %c4], %28 {strides = array<i32>} : memref<1x16x16x12xf32, #tpu.memory_space<vmem>>, vector<1x16x16x8xf32>,
    return
  }
  func.func @transform_0(%arg0: i32, %arg1: i32) -> (i32, i32, i32, i32, i32) {
    %c0_i32 = arith.constant 0 : i32
    %c0_i32_0 = arith.constant 0 : i32
    %c0_i32_1 = arith.constant 0 : i32
    %c0_i32_2 = arith.constant 0 : i32
    return %arg0, %arg1, %c0_i32, %c0_i32_0, %c0_i32_1 : i32, i32, i32, i32, i32
  }
  func.func @transform_1(%arg0: i32, %arg1: i32) -> (i32, i32) {
    %c0_i32 = arith.constant 0 : i32
    %c0_i32_0 = arith.constant 0 : i32
    %c0_i32_1 = arith.constant 0 : i32
    return %c0_i32, %c0_i32_0 : i32, i32
  }
  func.func @transform_2(%arg0: i32, %arg1: i32) -> (i32, i32) {
    %c0_i32 = arith.constant 0 : i32
    %c0_i32_0 = arith.constant 0 : i32
    %c0_i32_1 = arith.constant 0 : i32
    return %c0_i32, %c0_i32_0 : i32, i32
  }
  func.func @transform_3(%arg0: i32, %arg1: i32) -> (i32, i32, i32, i32) {
    %c0_i32 = arith.constant 0 : i32
    %c0_i32_0 = arith.constant 0 : i32
    %c0_i32_1 = arith.constant 0 : i32
    return %arg0, %arg1, %c0_i32, %c0_i32_0 : i32, i32, i32, i32
  }
}

</mosaic_0001>

<bundles_post_ra>
// kernel: rdb_conv_forward.1
= control target key start
LH: loop header
LB: loop body
LE: loop exit
PB: predicated region body
PF: predicated region fallthrough
CT: control target
= control target key end

     0   :  { %s2256_s12 = smov 0   ;;  %s2258_s13 = smov 0   ;;  %s4530_s0 = inlined_call_operand.vmem [shape: f32[2,1,18,18,4], index: 0, kind: input, shape index: {}]   ;;  %s4531_s1 = inlined_call_operand.vmem [shape: f32[36,8], index: 1, kind: input, shape index: {}]   ;;  %s4532_s2 = inlined_call_operand.vmem [shape: f32[1,8], index: 2, kind: input, shape index: {}]   ;;  %s4533_s3 = inlined_call_operand.vmem [shape: f32[2,16,16,12], index: 3, kind: output, shape index: {}]  }
   0x1   :  { %s2260_s14 = smov 0  }
   0x2 LB: > { %s25_s15 = sadd.s32 1, %s2222_s13  ;;  %p2098_p0 = scmp.ge.s32.totalorder %s2226_s14, 1  ;;  %s2226_s14 = sphi %s2260_s14, %s13_s14   ;;  %s2222_s13 = sphi %s2258_s13, %s5030_s13   ;;  %s2218_s12 = sphi %s2256_s12, %s5029_s12  }
   0x3   : > { %p27_p1 = scmp.ge.s32.totalorder %s25_s15, 2  ;;  %p157_p2 = scmp.lt.s32.totalorder %s2226_s14, 3 }
   0x5   : > { %s5032_s15 = smov (%p27_p1, %s25_s15), 0  ;;  %p158_p3 = pnand %p2098_p0, %p157_p2 }
   0x7   : > { %161 = sbr.rel (%p158_p3) target bundleno = 1106 (0x452), region = 32 }
   0xc   : > { %p190_p4 = scmp.lt.s32.totalorder %s2218_s12, 1  ;;  %vm363_vm0 = vcmask 1046528   ;;  %vm268_vm1 = vcmask 24576   ;;  %s2228_s24 = smov 4   ;;  %vm266_vm2 = vcmask 31744   ;;  %vm540_vm3 = vcmask 1045504  }
   0xd   : > { %s2229_s25 = smov 8   ;;  %s2230_s26 = smov 12   ;;  %vm1351_vm4 = vcmask 64512   ;;  %vm1384_vm5 = vcmask 97280   ;;  %vm1417_vm6 = vcmask 130048   ;;  %vm1450_vm7 = vcmask 162816  }
   0xe   : > { %s5034_s12 = smov (!%p190_p4, %s2218_s12), 1  ;;  %s2231_s27 = smov 16   ;;  %vm1483_vm8 = vcmask 195584   ;;  %vm1688_vm9 = vcmask 1043456   ;;  %vm1516_vm10 = vcmask 228352   ;;  %vm1549_vm11 = vcmask 261120  }
   0xf   : > { %s2153_s16 = smul.u32 432, %s5034_s12  ;;  %s2137_s20 = sshll.u32 %s5034_s12, 8  ;;  %vm1591_vm12 = vcmask 293888   ;;  %vm264_vm13 = vcmask 31745   ;;  %vm1965_vm14 = vcmask 97312  }
  0x10   : > { %s2303_s23 = scalar_lea.vmem %s4533_s3, %s2137_s20  ;;  %s2232_s28 = smov 20  }
  0x11   : > { %s2277_s19 = scalar_lea.vmem %s4530_s0, %s2153_s16  ;;  %s2233_s29 = smov 24  }
  0x12   : > { %v2280_v0 = vld [vmem:[%s2277_s19 + $0x30] sm:$0xff]  ;;  %v2283_v1 = vld [vmem:[%s2277_s19 + $0x38] sm:$0xff]  ;;  %v2291_v5 = vld [vmem:[%s2277_s19 + $0x20] sm:$0xff]  ;;  %s2234_s30 = smov 28   ;;  %s2235_s4 = smov 32  }
  0x13   : > { %v2286_v2 = vld [vmem:[%s2277_s19 + $0x18] sm:$0xff]  ;;  %v374_v3 = vrot.slane %v2280_v0, 1  ;;  %v375_v4 = vrot.slane %v2283_v1, 1  ;;  %4626 = vst [vmem:[#allocation2_spill] sm:$0xff] %v2291_v5  ;;  %v2295_v7 = vld [vmem:[%s2277_s19] sm:$0xff]  ;;  %v2298_v8 = vld [vmem:[%s2277_s19 + $0x8] sm:$0xff] }
  0x14   : > { %v369_v6 = vrot.slane %v2286_v2, 1  ;;  %v370_v9 = vrot.slane %v2291_v5, 1  ;;  %v364_v10 = vrot.slane %v2295_v7, 1  ;;  %v365_v11 = vrot.slane %v2298_v8, 1  ;;  %v2309_v12 = vld [vmem:[%s2277_s19 + $0x40] sm:$0x3] }
  0x15   : > { %v2312_v13 = vsel %vm363_vm0, %v374_v3, %v375_v4  ;;  %272 = vst.msk [vmem:[%s2303_s23 + $0x1f] sm:$0x1] %vm268_vm1, %v2309_v12  ;;  %v2318_v14 = vld [vmem:[%s2277_s19 + $0x28] sm:$0x3]  ;;  %v2330_v17 = vld [vmem:[%s2277_s19 + $0x10] sm:$0x3] }
  0x16   : > { %452 = vrot.lane.b32.xlu2 %v2312_v13, %s2228_s24  ;;  %v2323_v15 = vsel %vm363_vm0, %v369_v6, %v370_v9  ;;  %v366_v16 = vsel %vm363_vm0, %v364_v10, %v365_v11  ;;  %269 = vst.msk [vmem:[%s2303_s23 + $0xf] sm:$0x1] %vm268_vm1, %v2318_v14  ;;  %v377_v18 = vrot.slane %v2309_v12, 1  ;;  %v2337_v19 = vld [vmem:[%s2277_s19 + $0x58] sm:$0x3]  ;;  %v372_v20 = vrot.slane %v2318_v14, 1 }
  0x17   : > { %448 = vrot.lane.b32.xlu1 %v2323_v15, %s2228_s24  ;;  %444 = vrot.lane.b32.xlu0 %v366_v16, %s2228_s24  ;;  %v367_v21 = vrot.slane %v2330_v17, 1  ;;  %275 = vst.msk [vmem:[%s2303_s23 + $0x2f] sm:$0x1] %vm268_vm1, %v2337_v19  ;;  %v2345_v22 = vld [vmem:[%s2277_s19 + $0x88] sm:$0x3]  ;;  %v382_v37 = vrot.slane %v2337_v19, 1 }
  0x18   : > { %281 = vst.msk [vmem:[%s2303_s23 + $0x4f] sm:$0x1] %vm268_vm1, %v2345_v22  ;;  %v2351_v23 = vld [vmem:[%s2277_s19 + $0x70] sm:$0x3]  ;;  %v2354_v24 = vsel %vm363_vm0, %v375_v4, %v377_v18  ;;  %v2360_v25 = vsel %vm363_vm0, %v370_v9, %v372_v20  ;;  %v2364_v27 = vld [vmem:[%s2277_s19 + $0x60] sm:$0xff]  ;;  %v2367_v28 = vld [vmem:[%s2277_s19 + $0x68] sm:$0xff] }
  0x19   : > { %278 = vst.msk [vmem:[%s2303_s23 + $0x3f] sm:$0x1] %vm268_vm1, %v2351_v23  ;;  %v368_v26 = vsel %vm363_vm0, %v365_v11, %v367_v21  ;;  %v2370_v29 = vld [vmem:[%s2277_s19 + $0xa0] sm:$0x3]  ;;  %v2373_v30 = vld [vmem:[%s2277_s19 + $0x50] sm:$0xff]  ;;  %v2376_v31 = vld [vmem:[%s2277_s19 + $0x48] sm:$0xff] }
  0x1a   : > { %4627 = vst [vmem:[#allocation3_spill] sm:$0xff] %v2367_v28  ;;  %v2382_v32 = vld [vmem:[%s2277_s19 + $0xd0] sm:$0x3]  ;;  %v384_v33 = vrot.slane %v2364_v27, 1  ;;  %v385_v34 = vrot.slane %v2367_v28, 1  ;;  %v380_v36 = vrot.slane %v2373_v30, 1 }
  0x1b   : > { %4628 = vst [vmem:[#allocation4_spill] sm:$0xff] %v2373_v30  ;;  %v2395_v35 = vld [vmem:[%s2277_s19 + $0xb8] sm:$0x3]  ;;  %v379_v38 = vrot.slane %v2376_v31, 1  ;;  %v2407_v40 = vld [vmem:[%s2277_s19 + $0xe8] sm:$0x3] }
  0x1c   : > { %284 = vst.msk [vmem:[%s2303_s23 + $0x5f] sm:$0x1] %vm268_vm1, %v2370_v29  ;;  %v2404_v39 = vsel %vm363_vm0, %v384_v33, %v385_v34  ;;  %v2410_v41 = vsel %vm363_vm0, %v380_v36, %v382_v37  ;;  %v2416_v43 = vld [vmem:[%s2277_s19 + $0x80] sm:$0xff]  ;;  %v2422_v44 = vld [vmem:[%s2277_s19 + $0x78] sm:$0xff]  ;;  %v392_v46 = vrot.slane %v2345_v22, 1  ;;  %v387_v49 = vrot.slane %v2351_v23, 1 }
  0x1d   : > { %290 = vst.msk [vmem:[%s2303_s23 + $0x7f] sm:$0x1] %vm268_vm1, %v2382_v32  ;;  %v2413_v42 = vsel %vm363_vm0, %v379_v38, %v380_v36  ;;  %v390_v45 = vrot.slane %v2416_v43, 1  ;;  %v2433_v47 = vld [vmem:[%s2277_s19 + $0x118] sm:$0x3]  ;;  %v389_v48 = vrot.slane %v2422_v44, 1 }
  0x1e   : > { %454 = vrot.lane.b32.xlu2 %v2354_v24, %s2228_s24  ;;  %287 = vst.msk [vmem:[%s2303_s23 + $0x6f] sm:$0x1] %vm268_vm1, %v2395_v35  ;;  %v2444_v51 = vld [vmem:[%s2277_s19 + $0x100] sm:$0x3]  ;;  %v2450_v53 = vsel %vm363_vm0, %v385_v34, %v387_v49  ;;  %v2453_v54 = vld [vmem:[%s2277_s19 + $0xa8] sm:$0xff]  ;;  %v397_v61 = vrot.slane %v2370_v29, 1 }
  0x1f   : > { %450 = vrot.lane.b32.xlu1 %v2360_v25, %s2228_s24  ;;  %446 = vrot.lane.b32.xlu0 %v368_v26, %s2228_s24  ;;  %4629 = vst [vmem:[#allocation5_spill] sm:$0xff] %v2404_v39  ;;  %v2441_v50 = vsel %vm363_vm0, %v390_v45, %v392_v46  ;;  %v2447_v52 = vsel %vm363_vm0, %v389_v48, %v390_v45  ;;  %v2456_v55 = vld [vmem:[%s2277_s19 + $0xb0] sm:$0xff]  ;;  %v2462_v56 = vld [vmem:[%s2277_s19 + $0x98] sm:$0xff]  ;;  %v399_v58 = vrot.slane %v2453_v54, 1  ;;  %v407_v16 = vrot.slane %v2382_v32, 1 }
  0x20   : > { %4630 = vst [vmem:[#allocation6_spill] sm:$0xff] %v2416_v43  ;;  %v2465_v57 = vld [vmem:[%s2277_s19 + $0x90] sm:$0xff]  ;;  %v400_v59 = vrot.slane %v2456_v55, 1  ;;  %v395_v60 = vrot.slane %v2462_v56, 1  ;;  %v2491_v9 = vld [vmem:[%s2277_s19 + $0xc8] sm:$0xff]  ;;  %v2497_v10 = vld [vmem:[%s2277_s19 + $0xc0] sm:$0xff] }
  0x21   : > { %293 = vst.msk [vmem:[%s2303_s23 + $0x8f] sm:$0x1] %vm268_vm1, %v2407_v40  ;;  %v394_v62 = vrot.slane %v2465_v57, 1  ;;  %v2482_v3 = vld [vmem:[%s2277_s19 + $0x130] sm:$0x3]  ;;  %v405_v11 = vrot.slane %v2491_v9, 1 }
  0x22   : > { %299 = vst.msk [vmem:[%s2303_s23 + $0xaf] sm:$0x1] %vm268_vm1, %v2433_v47  ;;  %v2479_v63 = vsel %vm363_vm0, %v399_v58, %v400_v59  ;;  %v2485_v4 = vsel %vm363_vm0, %v395_v60, %v397_v61  ;;  %v2508_v18 = vld [vmem:[%s2277_s19 + $0x160] sm:$0x3]  ;;  %v404_v20 = vrot.slane %v2497_v10, 1  ;;  %v402_v21 = vrot.slane %v2395_v35, 1 }
  0x23   : > { %4631 = vst [vmem:[#allocation7_spill] sm:$0xff] %v2441_v50  ;;  %v2488_v6 = vsel %vm363_vm0, %v394_v62, %v395_v60  ;;  %v2516_v26 = vsel %vm363_vm0, %v405_v11, %v407_v16  ;;  %v2519_v33 = vld [vmem:[%s2277_s19 + $0x148] sm:$0x3]  ;;  %v2528_v37 = vld [vmem:[%s2277_s19 + $0xf0] sm:$0xff]  ;;  %v2531_v38 = vld [vmem:[%s2277_s19 + $0xf8] sm:$0xff]  ;;  %v412_v60 = vrot.slane %v2407_v40, 1 }
  0x24   : > { %4632 = vst [vmem:[#allocation8_spill] sm:$0xff] %v2447_v52  ;;  %v2522_v34 = vsel %vm363_vm0, %v404_v20, %v405_v11  ;;  %v2525_v36 = vsel %vm363_vm0, %v400_v59, %v402_v21  ;;  %v2537_v45 = vld [vmem:[%s2277_s19 + $0xe0] sm:$0xff]  ;;  %v2540_v46 = vld [vmem:[%s2277_s19 + $0xd8] sm:$0xff]  ;;  %v414_v48 = vrot.slane %v2528_v37, 1  ;;  %v415_v49 = vrot.slane %v2531_v38, 1  ;;  %v2569_v20 = vld [vmem:[%s2277_s19 + $0x110] sm:$0xff] }
  0x25   : > { %4633 = vst [vmem:[#allocation9_spill] sm:$0xff] %v2450_v53  ;;  %v2551_v58 = vld [vmem:[%s2277_s19 + $0x178] sm:$0x3]  ;;  %v410_v59 = vrot.slane %v2537_v45, 1  ;;  %v409_v61 = vrot.slane %v2540_v46, 1  ;;  %v2572_v21 = vld [vmem:[%s2277_s19 + $0x108] sm:$0xff] }
  0x26   : > { %460 = vrot.lane.b32.xlu2 %v2404_v39, %s2228_s24  ;;  %296 = vst.msk [vmem:[%s2303_s23 + $0x9f] sm:$0x1] %vm268_vm1, %v2444_v51  ;;  %v2560_v62 = vsel %vm363_vm0, %v414_v48, %v415_v49  ;;  %v420_v48 = vrot.slane %v2569_v20, 1  ;;  %v2693_v39 = vld [vmem:[%s2277_s19 + $0x168] sm:$0xff] }
  0x27   : > { %458 = vrot.lane.b32.xlu1 %v2410_v41, %s2228_s24  ;;  %456 = vrot.lane.b32.xlu0 %v2413_v42, %s2228_s24  ;;  %4634 = vst [vmem:[#allocation10_spill] sm:$0xff] %v2479_v63  ;;  %v2563_v11 = vsel %vm363_vm0, %v410_v59, %v412_v60  ;;  %v2566_v16 = vsel %vm363_vm0, %v409_v61, %v410_v59  ;;  %v422_v60 = vrot.slane %v2433_v47, 1  ;;  %v419_v59 = vrot.slane %v2572_v21, 1 }
  0x28   : > { %4635 = vst [vmem:[#allocation11_spill] sm:$0xff] %v2485_v4  ;;  %v417_v61 = vrot.slane %v2444_v51, 1 }
  0x29   : > { %4636 = vst [vmem:[#allocation12_spill] sm:$0xff] %v2488_v6 }
  0x2a   : > { %302 = vst.msk [vmem:[%s2303_s23 + $0xbf] sm:$0x1] %vm268_vm1, %v2482_v3 }
  0x2b   : > { %308 = vst.msk [vmem:[%s2303_s23 + $0xdf] sm:$0x1] %vm268_vm1, %v2508_v18 }
  0x2c   : > { %4637 = vst [vmem:[#allocation13_spill] sm:$0xff] %v2516_v26 }
  0x2d   : > { %4638 = vst [vmem:[#allocation14_spill] sm:$0xff] %v2522_v34 }
  0x2e   : > { %466 = vrot.lane.b32.xlu2 %v2441_v50, %s2228_s24  ;;  %4639 = vst [vmem:[#allocation15_spill] sm:$0xff] %v2525_v36  ;;  %v2638_v50 = vld [vmem:[%s2277_s19 + $0x158] sm:$0xff] }
  0x2f   : > { %464 = vrot.lane.b32.xlu1 %v2447_v52, %s2228_s24  ;;  %462 = vrot.lane.b32.xlu0 %v2450_v53, %s2228_s24  ;;  %305 = vst.msk [vmem:[%s2303_s23 + $0xcf] sm:$0x1] %vm268_vm1, %v2519_v33 }
  0x30   : > { %311 = vst.msk [vmem:[%s2303_s23 + $0xef] sm:$0x1] %vm268_vm1, %v2551_v58 }
  0x31   : > { %4640 = vst [vmem:[#allocation16_spill] sm:$0xff] %v2560_v62 }
  0x32   : > { %4641 = vst [vmem:[#allocation17_spill] sm:$0xff] %v2563_v11 }
  0x33   : > { %4642 = vst [vmem:[#allocation18_spill] sm:$0xff] %v2566_v16 }
  0x34   : > { %267 = vst.msk [vmem:[%s2303_s23 + $0x7] sm:$0xff] %vm266_vm2, %v2291_v5 }
  0x35   : > { %271 = vst.msk [vmem:[%s2303_s23 + $0x17] sm:$0xff] %vm266_vm2, %v2283_v1 }
  0x36   : > { %472 = vrot.lane.b32.xlu2 %v2479_v63, %s2228_s24  ;;  %v2597_v63 = vld [vmem:[%s2277_s19 + $0x140] sm:$0xff]  ;;  %274 = vst.msk [vmem:[%s2303_s23 + $0x27] sm:$0xff] %vm266_vm2, %v2373_v30 }
  0x37   : > { %470 = vrot.lane.b32.xlu1 %v2485_v4, %s2228_s24  ;;  %468 = vrot.lane.b32.xlu0 %v2488_v6, %s2228_s24  ;;  %277 = vst.msk [vmem:[%s2303_s23 + $0x37] sm:$0xff] %vm266_vm2, %v2367_v28  ;;  %v2690_v4 = vld [vmem:[%s2277_s19 + $0x170] sm:$0xff] }
  0x38   : > { %280 = vst.msk [vmem:[%s2303_s23 + $0x47] sm:$0xff] %vm266_vm2, %v2416_v43 }
  0x39   : > { %283 = vst.msk [vmem:[%s2303_s23 + $0x57] sm:$0xff] %vm266_vm2, %v2462_v56 }
  0x3a   : > { %286 = vst.msk [vmem:[%s2303_s23 + $0x67] sm:$0xff] %vm266_vm2, %v2456_v55 }
  0x3b   : > { %289 = vst.msk [vmem:[%s2303_s23 + $0x77] sm:$0xff] %vm266_vm2, %v2491_v9 }
  0x3c   : > { %292 = vst.msk [vmem:[%s2303_s23 + $0x87] sm:$0xff] %vm266_vm2, %v2537_v45 }
  0x3d   : > { %295 = vst.msk [vmem:[%s2303_s23 + $0x97] sm:$0xff] %vm266_vm2, %v2531_v38 }
  0x3e   : > { %478 = vrot.lane.b32.xlu2 %v2516_v26, %s2228_s24  ;;  %v2585_v26 = vsel %vm363_vm0, %v420_v48, %v422_v60  ;;  %298 = vst.msk [vmem:[%s2303_s23 + $0xa7] sm:$0xff] %vm266_vm2, %v2569_v20 }
  0x3f   : > { %476 = vrot.lane.b32.xlu1 %v2522_v34, %s2228_s24  ;;  %474 = vrot.lane.b32.xlu0 %v2525_v36, %s2228_s24  ;;  %4643 = vst [vmem:[#allocation19_spill] sm:$0xff] %v2585_v26  ;;  %v2600_v36 = vld [vmem:[%s2277_s19 + $0x128] sm:$0xff]  ;;  %v2603_v34 = vld [vmem:[%s2277_s19 + $0x120] sm:$0xff] }
  0x40   : > { %v425_v60 = vrot.slane %v2600_v36, 1  ;;  %301 = vst.msk [vmem:[%s2303_s23 + $0xb7] sm:$0xff] %vm266_vm2, %v2600_v36 }
  0x41   : > { %304 = vst.msk [vmem:[%s2303_s23 + $0xc7] sm:$0xff] %vm266_vm2, %v2597_v63 }
  0x42   : > { %307 = vst.msk [vmem:[%s2303_s23 + $0xd7] sm:$0xff] %vm266_vm2, %v2638_v50 }
  0x43   : > { %310 = vst.msk [vmem:[%s2303_s23 + $0xe7] sm:$0xff] %vm266_vm2, %v2690_v4 }
  0x46   : > { %484 = vrot.lane.b32.xlu2 %v2560_v62, %s2228_s24  ;;  %v2588_v62 = vsel %vm363_vm0, %v419_v59, %v420_v48  ;;  %v430_v48 = vrot.slane %v2597_v63, 1  ;;  %v427_v59 = vrot.slane %v2482_v3, 1 }
  0x47   : > { %482 = vrot.lane.b32.xlu1 %v2563_v11, %s2228_s24  ;;  %480 = vrot.lane.b32.xlu0 %v2566_v16, %s2228_s24  ;;  %4644 = vst [vmem:[#allocation20_spill] sm:$0xff] %v2588_v62  ;;  %v2591_v11 = vsel %vm363_vm0, %v415_v49, %v417_v61  ;;  %v2594_v16 = vld [vmem:[%s2277_s19 + $0x138] sm:$0xff]  ;;  %v424_v61 = vrot.slane %v2603_v34, 1 }
  0x48   : > { %4645 = vst [vmem:[#allocation21_spill] sm:$0xff] %v2591_v11  ;;  %v429_v49 = vrot.slane %v2594_v16, 1 }
  0x4e   : > { %490 = vrot.lane.b32.xlu2 %v2585_v26, %s2228_s24  ;;  %v2626_v26 = vsel %vm363_vm0, %v429_v49, %v430_v48  ;;  %v2644_v49 = vld [vmem:[%s2277_s19 + $0x150] sm:$0xff] }
  0x4f   : > { %488 = vrot.lane.b32.xlu1 %v2588_v62, %s2228_s24  ;;  %486 = vrot.lane.b32.xlu0 %v2591_v11, %s2228_s24  ;;  %4646 = vst [vmem:[#allocation22_spill] sm:$0xff] %v2626_v26  ;;  %v2632_v11 = vsel %vm363_vm0, %v425_v60, %v427_v59  ;;  %v2635_v62 = vsel %vm363_vm0, %v424_v61, %v425_v60  ;;  %v435_v60 = vrot.slane %v2638_v50, 1  ;;  %v437_v59 = vrot.slane %v2508_v18, 1 }
  0x50   : > { %4647 = vst [vmem:[#allocation23_spill] sm:$0xff] %v2632_v11  ;;  %v434_v61 = vrot.slane %v2644_v49, 1 }
  0x51   : > { %4648 = vst [vmem:[#allocation24_spill] sm:$0xff] %v2635_v62 }
  0x56   : > { %496 = vrot.lane.b32.xlu2 %v2626_v26, %s2228_s24  ;;  %v432_v26 = vrot.slane %v2519_v33, 1 }
  0x57   : > { %494 = vrot.lane.b32.xlu1 %v2632_v11, %s2228_s24  ;;  %492 = vrot.lane.b32.xlu0 %v2635_v62, %s2228_s24  ;;  %v2675_v62 = vsel %vm363_vm0, %v435_v60, %v437_v59  ;;  %v2681_v11 = vsel %vm363_vm0, %v434_v61, %v435_v60  ;;  %v440_v60 = vrot.slane %v2690_v4, 1  ;;  %v442_v59 = vrot.slane %v2551_v58, 1 }
  0x58   : > { %4649 = vst [vmem:[#allocation25_spill] sm:$0xff] %v2675_v62  ;;  %v2684_v6 = vsel %vm363_vm0, %v430_v48, %v432_v26  ;;  %v541_v26 = vrot.slane %v2295_v7, 2  ;;  %v542_v48 = vrot.slane %v2298_v8, 2  ;;  %v439_v61 = vrot.slane %v2693_v39, 1 }
  0x59   : > { %4650 = vst [vmem:[#allocation26_spill] sm:$0xff] %v2681_v11  ;;  %v2714_v53 = vsel %vm363_vm0, %v440_v60, %v442_v59  ;;  %v547_v7 = vrot.slane %v2291_v5, 2  ;;  %v549_v8 = vrot.slane %v2318_v14, 2  ;;  %v544_v59 = vrot.slane %v2330_v17, 2 }
  0x5a   : > { %4651 = vst [vmem:[#allocation27_spill] sm:$0xff] %v2684_v6  ;;  %v556_v14 = vrot.slane %v2376_v31, 2  ;;  %v557_v17 = vrot.slane %v2373_v30, 2 }
  0x5b   : > { %4652 = vst [vmem:[#allocation28_spill] sm:$0xff] %v2714_v53 }
  0x5e   : > { %502 = vrot.lane.b32.xlu2 %v2675_v62, %s2228_s24  ;;  %v543_v62 = vsel %vm540_vm3, %v541_v26, %v542_v48  ;;  %v546_v26 = vrot.slane %v2286_v2, 2 }
  0x5f   : > { %500 = vrot.lane.b32.xlu1 %v2681_v11, %s2228_s24  ;;  %498 = vrot.lane.b32.xlu0 %v2684_v6, %s2228_s24  ;;  %v2717_v11 = vsel %vm363_vm0, %v439_v61, %v440_v60  ;;  %v2729_v60 = vsel %vm540_vm3, %v547_v7, %v549_v8  ;;  %v552_v8 = vrot.slane %v2283_v1, 2 }
  0x60   : > { %4653 = vst [vmem:[#allocation29_spill] sm:$0xff] %v2717_v11  ;;  %v2732_v61 = vsel %vm540_vm3, %v546_v26, %v547_v7  ;;  %v554_v7 = vrot.slane %v2309_v12, 2  ;;  %v2748_v26 = vsel %vm540_vm3, %v556_v14, %v557_v17  ;;  %v562_v12 = vrot.slane %v2367_v28, 2 }
  0x61   : > { %4654 = vst [vmem:[#allocation30_spill] sm:$0xff] %v2729_v60  ;;  %v564_v14 = vrot.slane %v2351_v23, 2  ;;  %v572_v23 = vrot.slane %v2462_v56, 2 }
  0x62   : > { %4656 = vst [vmem:[#allocation32_spill] sm:$0xff] %v2748_v26 }
  0x66   : > { %621 = vrot.lane.b32.xlu2 %v543_v62, %s2229_s25  ;;  %v545_v62 = vsel %vm540_vm3, %v542_v48, %v544_v59  ;;  %v551_v48 = vrot.slane %v2280_v0, 2  ;;  %v2751_v59 = vsel %vm540_vm3, %v552_v8, %v554_v7  ;;  %v561_v7 = vrot.slane %v2364_v27, 2 }
  0x67   : > { %506 = vrot.lane.b32.xlu1 %v2714_v53, %s2228_s24  ;;  %504 = vrot.lane.b32.xlu0 %v2717_v11, %s2228_s24 }
  0x6e   : > { %627 = vrot.lane.b32.xlu2 %v2729_v60, %s2229_s25 }
  0x6f   : > { %625 = vrot.lane.b32.xlu1 %v2732_v61, %s2229_s25  ;;  %623 = vrot.lane.b32.xlu0 %v545_v62, %s2229_s25  ;;  %v2754_v62 = vsel %vm540_vm3, %v551_v48, %v552_v8  ;;  %v559_v8 = vrot.slane %v2337_v19, 2  ;;  %v2769_v48 = vsel %vm540_vm3, %v562_v12, %v564_v14  ;;  %v571_v19 = vrot.slane %v2465_v57, 2 }
  0x70   : > { %v2742_v11 = vpop.permute.xlu2 %452  ;;  %4658 = vst [vmem:[#allocation34_spill] sm:$0xff] %v2769_v48 }
  0x71   : > { %4655 = vst [vmem:[#allocation31_spill] sm:$0xff] %v2742_v11  ;;  %v2775_v60 = vsel %vm540_vm3, %v557_v17, %v559_v8  ;;  %v569_v17 = vrot.slane %v2345_v22, 2  ;;  %v2791_v8 = vsel %vm540_vm3, %v571_v19, %v572_v23  ;;  %v577_v22 = vrot.slane %v2456_v55, 2 }
  0x72   : > { %4660 = vst [vmem:[#allocation36_spill] sm:$0xff] %v2775_v60  ;;  %v579_v19 = vrot.slane %v2395_v35, 2  ;;  %v587_v35 = vrot.slane %v2537_v45, 2 }
  0x73   : > { %4662 = vst [vmem:[#allocation38_spill] sm:$0xff] %v2791_v8 }
  0x76   : > { %633 = vrot.lane.b32.xlu2 %v2748_v26, %s2229_s25  ;;  %v2772_v26 = vsel %vm540_vm3, %v561_v7, %v562_v12  ;;  %v567_v12 = vrot.slane %v2416_v43, 2  ;;  %v566_v7 = vrot.slane %v2422_v44, 2 }
  0x77   : > { %631 = vrot.lane.b32.xlu1 %v2751_v59, %s2229_s25  ;;  %629 = vrot.lane.b32.xlu0 %v2754_v62, %s2229_s25  ;;  %4659 = vst [vmem:[#allocation35_spill] sm:$0xff] %v2772_v26 }
  0x78   : > { %v2764_v11 = vpop.permute.xlu2 %454 }
  0x79   : > { %4657 = vst [vmem:[#allocation33_spill] sm:$0xff] %v2764_v11  ;;  %v2794_v11 = vsel %vm540_vm3, %v567_v12, %v569_v17  ;;  %v576_v17 = vrot.slane %v2453_v54, 2 }
  0x7a   : > { %4663 = vst [vmem:[#allocation39_spill] sm:$0xff] %v2794_v11 }
  0x7e   : > { %639 = vrot.lane.b32.xlu2 %v2769_v48, %s2229_s25  ;;  %v2797_v48 = vsel %vm540_vm3, %v566_v7, %v567_v12  ;;  %v574_v12 = vrot.slane %v2370_v29, 2  ;;  %v586_v29 = vrot.slane %v2540_v46, 2 }
  0x7f   : > { %637 = vrot.lane.b32.xlu1 %v2772_v26, %s2229_s25  ;;  %635 = vrot.lane.b32.xlu0 %v2775_v60, %s2229_s25  ;;  %4664 = vst [vmem:[#allocation40_spill] sm:$0xff] %v2797_v48 }
  0x80   : > { %v2785_v14 = vpop.permute.xlu2 %460 }
  0x81   : > { %4661 = vst [vmem:[#allocation37_spill] sm:$0xff] %v2785_v14 }
  0x86   : > { %645 = vrot.lane.b32.xlu2 %v2791_v8, %s2229_s25  ;;  %v2816_v8 = vsel %vm540_vm3, %v577_v22, %v579_v19 }
  0x87   : > { %643 = vrot.lane.b32.xlu1 %v2794_v11, %s2229_s25  ;;  %641 = vrot.lane.b32.xlu0 %v2797_v48, %s2229_s25  ;;  %4668 = vst [vmem:[#allocation44_spill] sm:$0xff] %v2816_v8  ;;  %v2819_v11 = vsel %vm540_vm3, %v576_v17, %v577_v22  ;;  %v2822_v48 = vsel %vm540_vm3, %v572_v23, %v574_v12  ;;  %v582_v22 = vrot.slane %v2491_v9, 2  ;;  %v584_v23 = vrot.slane %v2382_v32, 2 }
  0x88   : > { %v2807_v14 = vpop.permute.xlu2 %466  ;;  %v581_v17 = vrot.slane %v2497_v10, 2  ;;  %v592_v32 = vrot.slane %v2531_v38, 2 }
  0x89   : > { %4665 = vst [vmem:[#allocation41_spill] sm:$0xff] %v2807_v14  ;;  %v2811_v7 = vpop.permute.xlu1 %448  ;;  %v2813_v60 = vpop.permute.xlu0 %444 }
  0x8a   : > { %4666 = vst [vmem:[#allocation42_spill] sm:$0xff] %v2811_v7  ;;  %v2845_v7 = vsel %vm540_vm3, %v582_v22, %v584_v23  ;;  %v591_v23 = vrot.slane %v2528_v37, 2 }
  0x8b   : > { %4667 = vst [vmem:[#allocation43_spill] sm:$0xff] %v2813_v60  ;;  %v2842_v60 = vsel %vm540_vm3, %v586_v29, %v587_v35  ;;  %v594_v29 = vrot.slane %v2444_v51, 2  ;;  %v602_v51 = vrot.slane %v2600_v36, 2 }
  0x8c   : > { %4672 = vst [vmem:[#allocation48_spill] sm:$0xff] %v2842_v60 }
  0x8d   : > { %4673 = vst [vmem:[#allocation49_spill] sm:$0xff] %v2845_v7 }
  0x8e   : > { %651 = vrot.lane.b32.xlu2 %v2816_v8, %s2229_s25  ;;  %v2848_v8 = vsel %vm540_vm3, %v581_v17, %v582_v22  ;;  %v589_v22 = vrot.slane %v2407_v40, 2  ;;  %v601_v40 = vrot.slane %v2603_v34, 2 }
  0x8f   : > { %649 = vrot.lane.b32.xlu1 %v2819_v11, %s2229_s25  ;;  %647 = vrot.lane.b32.xlu0 %v2822_v48, %s2229_s25  ;;  %4674 = vst [vmem:[#allocation50_spill] sm:$0xff] %v2848_v8 }
  0x90   : > { %v2832_v19 = vpop.permute.xlu2 %472 }
  0x91   : > { %4669 = vst [vmem:[#allocation45_spill] sm:$0xff] %v2832_v19  ;;  %v2837_v12 = vpop.permute.xlu1 %450  ;;  %v2839_v14 = vpop.permute.xlu0 %446  ;;  %v2867_v19 = vsel %vm540_vm3, %v592_v32, %v594_v29 }
  0x92   : > { %4670 = vst [vmem:[#allocation46_spill] sm:$0xff] %v2837_v12 }
  0x93   : > { %4671 = vst [vmem:[#allocation47_spill] sm:$0xff] %v2839_v14 }
  0x94   : > { %4678 = vst [vmem:[#allocation54_spill] sm:$0xff] %v2867_v19 }
  0x96   : > { %657 = vrot.lane.b32.xlu2 %v2842_v60, %s2229_s25  ;;  %v2870_v60 = vsel %vm540_vm3, %v591_v23, %v592_v32  ;;  %v597_v32 = vrot.slane %v2569_v20, 2  ;;  %v596_v23 = vrot.slane %v2572_v21, 2 }
  0x97   : > { %655 = vrot.lane.b32.xlu1 %v2845_v7, %s2229_s25  ;;  %653 = vrot.lane.b32.xlu0 %v2848_v8, %s2229_s25  ;;  %v2873_v8 = vsel %vm540_vm3, %v587_v35, %v589_v22  ;;  %v599_v35 = vrot.slane %v2433_v47, 2  ;;  %v607_v47 = vrot.slane %v2597_v63, 2 }
  0x98   : > { %v2858_v12 = vpop.permute.xlu2 %478  ;;  %4679 = vst [vmem:[#allocation55_spill] sm:$0xff] %v2873_v8 }
  0x99   : > { %4675 = vst [vmem:[#allocation51_spill] sm:$0xff] %v2858_v12  ;;  %v2862_v17 = vpop.permute.xlu1 %458  ;;  %v2864_v14 = vpop.permute.xlu0 %456  ;;  %v2896_v12 = vsel %vm540_vm3, %v597_v32, %v599_v35  ;;  %v606_v35 = vrot.slane %v2594_v16, 2 }
  0x9a   : > { %4676 = vst [vmem:[#allocation52_spill] sm:$0xff] %v2862_v17 }
  0x9b   : > { %4677 = vst [vmem:[#allocation53_spill] sm:$0xff] %v2864_v14  ;;  %v2893_v14 = vsel %vm540_vm3, %v601_v40, %v602_v51  ;;  %v609_v40 = vrot.slane %v2519_v33, 2  ;;  %v617_v33 = vrot.slane %v2690_v4, 2 }
  0x9c   : > { %4683 = vst [vmem:[#allocation59_spill] sm:$0xff] %v2893_v14 }
  0x9d   : > { %4684 = vst [vmem:[#allocation60_spill] sm:$0xff] %v2896_v12 }
  0x9e   : > { %663 = vrot.lane.b32.xlu2 %v2867_v19, %s2229_s25  ;;  %v2899_v19 = vsel %vm540_vm3, %v596_v23, %v597_v32  ;;  %v604_v32 = vrot.slane %v2482_v3, 2  ;;  %v616_v3 = vrot.slane %v2693_v39, 2 }
  0x9f   : > { %661 = vrot.lane.b32.xlu1 %v2870_v60, %s2229_s25  ;;  %659 = vrot.lane.b32.xlu0 %v2873_v8, %s2229_s25  ;;  %4685 = vst [vmem:[#allocation61_spill] sm:$0xff] %v2899_v19 }
  0xa0   : > { %v2883_v29 = vpop.permute.xlu2 %484 }
  0xa1   : > { %4680 = vst [vmem:[#allocation56_spill] sm:$0xff] %v2883_v29  ;;  %v2888_v22 = vpop.permute.xlu1 %464  ;;  %v2890_v17 = vpop.permute.xlu0 %462  ;;  %v2918_v29 = vsel %vm540_vm3, %v607_v47, %v609_v40 }
  0xa2   : > { %4681 = vst [vmem:[#allocation57_spill] sm:$0xff] %v2888_v22 }
  0xa3   : > { %4682 = vst [vmem:[#allocation58_spill] sm:$0xff] %v2890_v17 }
  0xa4   : > { %4689 = vst [vmem:[#allocation65_spill] sm:$0xff] %v2918_v29 }
  0xa6   : > { %669 = vrot.lane.b32.xlu2 %v2893_v14, %s2229_s25  ;;  %v2921_v14 = vsel %vm540_vm3, %v606_v35, %v607_v47  ;;  %v612_v47 = vrot.slane %v2638_v50, 2  ;;  %v611_v35 = vrot.slane %v2644_v49, 2 }
  0xa7   : > { %667 = vrot.lane.b32.xlu1 %v2896_v12, %s2229_s25  ;;  %665 = vrot.lane.b32.xlu0 %v2899_v19, %s2229_s25  ;;  %4690 = vst [vmem:[#allocation66_spill] sm:$0xff] %v2921_v14  ;;  %v2924_v19 = vsel %vm540_vm3, %v602_v51, %v604_v32  ;;  %v614_v51 = vrot.slane %v2508_v18, 2 }
  0xa8   : > { %v2909_v22 = vpop.permute.xlu2 %490  ;;  %4691 = vst [vmem:[#allocation67_spill] sm:$0xff] %v2924_v19 }
  0xa9   : > { %4686 = vst [vmem:[#allocation62_spill] sm:$0xff] %v2909_v22  ;;  %v2913_v23 = vpop.permute.xlu1 %470  ;;  %v2915_v17 = vpop.permute.xlu0 %468  ;;  %v2944_v22 = vsel %vm540_vm3, %v616_v3, %v617_v33  ;;  %v619_v3 = vrot.slane %v2551_v58, 2 }
  0xaa   : > { %4687 = vst [vmem:[#allocation63_spill] sm:$0xff] %v2913_v23  ;;  %v2947_v23 = vsel %vm540_vm3, %v612_v47, %v614_v51 }
  0xab   : > { %4688 = vst [vmem:[#allocation64_spill] sm:$0xff] %v2915_v17 }
  0xae   : > { %675 = vrot.lane.b32.xlu2 %v2918_v29, %s2229_s25  ;;  %v2950_v29 = vsel %vm540_vm3, %v611_v35, %v612_v47  ;;  %v2966_v47 = vsel %vm540_vm3, %v617_v33, %v619_v3 }
  0xaf   : > { %673 = vrot.lane.b32.xlu1 %v2921_v14, %s2229_s25  ;;  %671 = vrot.lane.b32.xlu0 %v2924_v19, %s2229_s25  ;;  %4698 = vst [vmem:[#allocation74_spill] sm:$0xff] %v2966_v47 }
  0xb0   : > { %v2934_v40 = vpop.permute.xlu2 %496 }
  0xb1   : > { %4692 = vst [vmem:[#allocation68_spill] sm:$0xff] %v2934_v40  ;;  %v2939_v32 = vpop.permute.xlu1 %476  ;;  %v2941_v17 = vpop.permute.xlu0 %474 }
  0xb2   : > { %4693 = vst [vmem:[#allocation69_spill] sm:$0xff] %v2939_v32 }
  0xb3   : > { %4694 = vst [vmem:[#allocation70_spill] sm:$0xff] %v2941_v17 }
  0xb6   : > { %681 = vrot.lane.b32.xlu2 %v2944_v22, %s2229_s25 }
  0xb7   : > { %679 = vrot.lane.b32.xlu1 %v2947_v23, %s2229_s25  ;;  %677 = vrot.lane.b32.xlu0 %v2950_v29, %s2229_s25 }
  0xb8   : > { %v2958_v18 = vpop.permute.xlu2 %502 }
  0xb9   : > { %4695 = vst [vmem:[#allocation71_spill] sm:$0xff] %v2958_v18  ;;  %v2961_v40 = vpop.permute.xlu1 %482  ;;  %v2963_v51 = vpop.permute.xlu0 %480 }
  0xba   : > { %4696 = vst [vmem:[#allocation72_spill] sm:$0xff] %v2961_v40 }
  0xbb   : > { %4697 = vst [vmem:[#allocation73_spill] sm:$0xff] %v2963_v51 }
  0xbe   : > { %721 = vrot.lane.b32.xlu2 %v2291_v5, %s2230_s26 }
  0xbf   : > { %719 = vrot.lane.b32.xlu1 %v2286_v2, %s2230_s26  ;;  %683 = vrot.lane.b32.xlu0 %v2966_v47, %s2229_s25 }
  0xc0   : > { %v2974_v35 = vpop.permute.xlu2 %621 }
  0xc1   : > { %4699 = vst [vmem:[#allocation75_spill] sm:$0xff] %v2974_v35  ;;  %v2976_v58 = vpop.permute.xlu1 %488  ;;  %v2978_v18 = vpop.permute.xlu0 %486 }
  0xc2   : > { %4700 = vst [vmem:[#allocation76_spill] sm:$0xff] %v2976_v58 }
  0xc3   : > { %4701 = vst [vmem:[#allocation77_spill] sm:$0xff] %v2978_v18 }
  0xc6   : > { %727 = vrot.lane.b32.xlu2 %v2376_v31, %s2230_s26 }
  0xc7   : > { %725 = vrot.lane.b32.xlu1 %v2283_v1, %s2230_s26  ;;  %723 = vrot.lane.b32.xlu0 %v2280_v0, %s2230_s26 }
  0xc8   : > { %v2986_v33 = vpop.permute.xlu2 %627 }
  0xc9   : > { %4702 = vst [vmem:[#allocation78_spill] sm:$0xff] %v2986_v33  ;;  %v2988_v2 = vpop.permute.xlu1 %494  ;;  %v2990_v3 = vpop.permute.xlu0 %492 }
  0xca   : > { %4703 = vst [vmem:[#allocation79_spill] sm:$0xff] %v2988_v2 }
  0xcb   : > { %4704 = vst [vmem:[#allocation80_spill] sm:$0xff] %v2990_v3 }
  0xce   : > { %733 = vrot.lane.b32.xlu2 %v2367_v28, %s2230_s26 }
  0xcf   : > { %731 = vrot.lane.b32.xlu1 %v2364_v27, %s2230_s26  ;;  %729 = vrot.lane.b32.xlu0 %v2373_v30, %s2230_s26 }
  0xd0   : > { %v2998_v5 = vpop.permute.xlu2 %633 }
  0xd1   : > { %4705 = vst [vmem:[#allocation81_spill] sm:$0xff] %v2998_v5  ;;  %v3000_v35 = vpop.permute.xlu1 %500  ;;  %v3002_v0 = vpop.permute.xlu0 %498 }
  0xd2   : > { %4706 = vst [vmem:[#allocation82_spill] sm:$0xff] %v3000_v35 }
  0xd3   : > { %4707 = vst [vmem:[#allocation83_spill] sm:$0xff] %v3002_v0 }
  0xd6   : > { %739 = vrot.lane.b32.xlu2 %v2465_v57, %s2230_s26 }
  0xd7   : > { %737 = vrot.lane.b32.xlu1 %v2416_v43, %s2230_s26  ;;  %735 = vrot.lane.b32.xlu0 %v2422_v44, %s2230_s26 }
  0xd8   : > { %v3010_v33 = vpop.permute.xlu2 %639 }
  0xd9   : > { %4708 = vst [vmem:[#allocation84_spill] sm:$0xff] %v3010_v33  ;;  %v3012_v3 = vpop.permute.xlu1 %506  ;;  %v3014_v18 = vpop.permute.xlu0 %504 }
  0xda   : > { %4709 = vst [vmem:[#allocation85_spill] sm:$0xff] %v3012_v3 }
  0xdb   : > { %4710 = vst [vmem:[#allocation86_spill] sm:$0xff] %v3014_v18 }
  0xde   : > { %745 = vrot.lane.b32.xlu2 %v2456_v55, %s2230_s26 }
  0xdf   : > { %743 = vrot.lane.b32.xlu1 %v2453_v54, %s2230_s26  ;;  %741 = vrot.lane.b32.xlu0 %v2462_v56, %s2230_s26 }
  0xe0   : > { %v3022_v5 = vpop.permute.xlu2 %645 }
  0xe1   : > { %4711 = vst [vmem:[#allocation87_spill] sm:$0xff] %v3022_v5  ;;  %v3024_v0 = vpop.permute.xlu1 %625  ;;  %v3026_v33 = vpop.permute.xlu0 %623  ;;  %v3043_v5 = vld [vmem:[%s2277_s19 + $0x188] sm:$0xff] }
  0xe2   : > { %4712 = vst [vmem:[#allocation88_spill] sm:$0xff] %v3024_v0 }
  0xe3   : > { %4713 = vst [vmem:[#allocation89_spill] sm:$0xff] %v3026_v33 }
  0xe4   : > { %313 = vst.msk [vmem:[%s2303_s23 + $0xf7] sm:$0xff] %vm266_vm2, %v3043_v5 }
  0xe6   : > { %751 = vrot.lane.b32.xlu2 %v2540_v46, %s2230_s26 }
  0xe7   : > { %749 = vrot.lane.b32.xlu1 %v2491_v9, %s2230_s26  ;;  %747 = vrot.lane.b32.xlu0 %v2497_v10, %s2230_s26 }
  0xe8   : > { %v3034_v18 = vpop.permute.xlu2 %651 }
  0xe9   : > { %4714 = vst [vmem:[#allocation90_spill] sm:$0xff] %v3034_v18  ;;  %v3036_v3 = vpop.permute.xlu1 %631  ;;  %v3038_v51 = vpop.permute.xlu0 %629 }
  0xea   : > { %4715 = vst [vmem:[#allocation91_spill] sm:$0xff] %v3036_v3 }
  0xeb   : > { %4716 = vst [vmem:[#allocation92_spill] sm:$0xff] %v3038_v51 }
  0xee   : > { %757 = vrot.lane.b32.xlu2 %v2531_v38, %s2230_s26 }
  0xef   : > { %755 = vrot.lane.b32.xlu1 %v2528_v37, %s2230_s26  ;;  %753 = vrot.lane.b32.xlu0 %v2537_v45, %s2230_s26 }
  0xf0   : > { %v3052_v33 = vpop.permute.xlu2 %657 }
  0xf1   : > { %4717 = vst [vmem:[#allocation93_spill] sm:$0xff] %v3052_v33  ;;  %v3054_v0 = vpop.permute.xlu1 %637  ;;  %v3056_v3 = vpop.permute.xlu0 %635 }
  0xf2   : > { %4718 = vst [vmem:[#allocation94_spill] sm:$0xff] %v3054_v0 }
  0xf3   : > { %4719 = vst [vmem:[#allocation95_spill] sm:$0xff] %v3056_v3 }
  0xf6   : > { %763 = vrot.lane.b32.xlu2 %v2603_v34, %s2230_s26 }
  0xf7   : > { %761 = vrot.lane.b32.xlu1 %v2569_v20, %s2230_s26  ;;  %759 = vrot.lane.b32.xlu0 %v2572_v21, %s2230_s26 }
  0xf8   : > { %v3064_v51 = vpop.permute.xlu2 %663 }
  0xf9   : > { %4720 = vst [vmem:[#allocation96_spill] sm:$0xff] %v3064_v51  ;;  %v3066_v35 = vpop.permute.xlu1 %643  ;;  %v3068_v18 = vpop.permute.xlu0 %641 }
  0xfa   : > { %4721 = vst [vmem:[#allocation97_spill] sm:$0xff] %v3066_v35 }
  0xfb   : > { %4722 = vst [vmem:[#allocation98_spill] sm:$0xff] %v3068_v18 }
  0xfe   : > { %769 = vrot.lane.b32.xlu2 %v2597_v63, %s2230_s26 }
  0xff   : > { %767 = vrot.lane.b32.xlu1 %v2594_v16, %s2230_s26  ;;  %765 = vrot.lane.b32.xlu0 %v2600_v36, %s2230_s26 }
 0x100   : > { %v3076_v3 = vpop.permute.xlu2 %669 }
 0x101   : > { %4723 = vst [vmem:[#allocation99_spill] sm:$0xff] %v3076_v3  ;;  %v3078_v0 = vpop.permute.xlu1 %649  ;;  %v3080_v33 = vpop.permute.xlu0 %647  ;;  %v3095_v3 = vld [vmem:[%s2277_s19 + $0x180] sm:$0xff] }
 0x102   : > { %4724 = vst [vmem:[#allocation100_spill] sm:$0xff] %v3078_v0 }
 0x103   : > { %4725 = vst [vmem:[#allocation101_spill] sm:$0xff] %v3080_v33 }
 0x104   : > { %4729 = vst [vmem:[#allocation105_spill] sm:$0xff] %v3095_v3 }
 0x106   : > { %775 = vrot.lane.b32.xlu2 %v2693_v39, %s2230_s26 }
 0x107   : > { %773 = vrot.lane.b32.xlu1 %v2638_v50, %s2230_s26  ;;  %771 = vrot.lane.b32.xlu0 %v2644_v49, %s2230_s26 }
 0x108   : > { %v3088_v35 = vpop.permute.xlu2 %675 }
 0x109   : > { %4726 = vst [vmem:[#allocation102_spill] sm:$0xff] %v3088_v35  ;;  %v3090_v18 = vpop.permute.xlu1 %655  ;;  %v3092_v51 = vpop.permute.xlu0 %653 }
 0x10a   : > { %4727 = vst [vmem:[#allocation103_spill] sm:$0xff] %v3090_v18 }
 0x10b   : > { %4728 = vst [vmem:[#allocation104_spill] sm:$0xff] %v3092_v51 }
 0x10e   : > { %781 = vrot.lane.b32.xlu2 %v3043_v5, %s2230_s26 }
 0x10f   : > { %779 = vrot.lane.b32.xlu1 %v3095_v3, %s2230_s26  ;;  %777 = vrot.lane.b32.xlu0 %v2690_v4, %s2230_s26 }
 0x110   : > { %v3103_v0 = vpop.permute.xlu2 %681 }
 0x111   : > { %4730 = vst [vmem:[#allocation106_spill] sm:$0xff] %v3103_v0  ;;  %v3105_v17 = vpop.permute.xlu1 %661  ;;  %v3107_v35 = vpop.permute.xlu0 %659 }
 0x112   : > { %4731 = vst [vmem:[#allocation107_spill] sm:$0xff] %v3105_v17 }
 0x113   : > { %4732 = vst [vmem:[#allocation108_spill] sm:$0xff] %v3107_v35 }
 0x116   : > { %825 = vrot.lane.b32.xlu2 %v2312_v13, %s2231_s27 }
 0x117   : > { %823 = vrot.lane.b32.xlu1 %v2360_v25, %s2231_s27  ;;  %821 = vrot.lane.b32.xlu0 %v2323_v15, %s2231_s27 }
 0x118   : > { %v3115_v18 = vpop.permute.xlu2 %721 }
 0x119   : > { %4733 = vst [vmem:[#allocation109_spill] sm:$0xff] %v3115_v18  ;;  %v3117_v2 = vpop.permute.xlu1 %667  ;;  %v3119_v58 = vpop.permute.xlu0 %665  ;;  %v4739_v18 = vld [vmem:[#allocation9_spill] sm:$0xff] }
 0x11a   : > { %4734 = vst [vmem:[#allocation110_spill] sm:$0xff] %v3117_v2  ;;  %v4740_v2 = vld [vmem:[#allocation5_spill] sm:$0xff] }
 0x11b   : > { %4735 = vst [vmem:[#allocation111_spill] sm:$0xff] %v3119_v58 }
 0x11e   : > { %831 = vrot.lane.b32.xlu2 %v2410_v41, %s2231_s27 }
 0x11f   : > { %829 = vrot.lane.b32.xlu1 %v2413_v42, %s2231_s27  ;;  %827 = vrot.lane.b32.xlu0 %v2354_v24, %s2231_s27 }
 0x120   : > { %v3127_v0 = vpop.permute.xlu2 %727 }
 0x121   : > { %4736 = vst [vmem:[#allocation112_spill] sm:$0xff] %v3127_v0  ;;  %v3129_v25 = vpop.permute.xlu1 %673  ;;  %v3131_v15 = vpop.permute.xlu0 %671  ;;  %v4744_v0 = vld [vmem:[#allocation11_spill] sm:$0xff] }
 0x122   : > { %4737 = vst [vmem:[#allocation113_spill] sm:$0xff] %v3129_v25  ;;  %v4745_v25 = vld [vmem:[#allocation12_spill] sm:$0xff] }
 0x123   : > { %4738 = vst [vmem:[#allocation114_spill] sm:$0xff] %v3131_v15 }
 0x126   : > { %837 = vrot.lane.b32.xlu2 %v2447_v52, %s2231_s27  ;;  %v4746_v52 = vld [vmem:[#allocation7_spill] sm:$0xff] }
 0x127   : > { %835 = vrot.lane.b32.xlu1 %v4739_v18, %s2231_s27  ;;  %833 = vrot.lane.b32.xlu0 %v4740_v2, %s2231_s27 }
 0x128   : > { %v3139_v17 = vpop.permute.xlu2 %733 }
 0x129   : > { %4741 = vst [vmem:[#allocation9_spill] sm:$0xff] %v3139_v17  ;;  %v3141_v58 = vpop.permute.xlu1 %679  ;;  %v3143_v35 = vpop.permute.xlu0 %677 }
 0x12a   : > { %4742 = vst [vmem:[#allocation5_spill] sm:$0xff] %v3141_v58  ;;  %v4750_v58 = vld [vmem:[#allocation14_spill] sm:$0xff] }
 0x12b   : > { %4743 = vst [vmem:[#allocation115_spill] sm:$0xff] %v3143_v35  ;;  %v4751_v35 = vld [vmem:[#allocation15_spill] sm:$0xff] }
 0x12e   : > { %843 = vrot.lane.b32.xlu2 %v4744_v0, %s2231_s27  ;;  %v4752_v0 = vld [vmem:[#allocation10_spill] sm:$0xff] }
 0x12f   : > { %841 = vrot.lane.b32.xlu1 %v4745_v25, %s2231_s27  ;;  %839 = vrot.lane.b32.xlu0 %v4746_v52, %s2231_s27 }
 0x130   : > { %v3151_v15 = vpop.permute.xlu2 %739 }
 0x131   : > { %4747 = vst [vmem:[#allocation116_spill] sm:$0xff] %v3151_v15  ;;  %v3153_v40 = vpop.permute.xlu1 %719  ;;  %v3155_v17 = vpop.permute.xlu0 %683  ;;  %v4756_v15 = vld [vmem:[#allocation17_spill] sm:$0xff] }
 0x132   : > { %4748 = vst [vmem:[#allocation117_spill] sm:$0xff] %v3153_v40  ;;  %v4757_v40 = vld [vmem:[#allocation18_spill] sm:$0xff] }
 0x133   : > { %4749 = vst [vmem:[#allocation118_spill] sm:$0xff] %v3155_v17 }
 0x136   : > { %849 = vrot.lane.b32.xlu2 %v4750_v58, %s2231_s27  ;;  %v4758_v58 = vld [vmem:[#allocation13_spill] sm:$0xff] }
 0x137   : > { %847 = vrot.lane.b32.xlu1 %v4751_v35, %s2231_s27  ;;  %845 = vrot.lane.b32.xlu0 %v4752_v0, %s2231_s27 }
 0x138   : > { %v3163_v51 = vpop.permute.xlu2 %745 }
 0x139   : > { %4753 = vst [vmem:[#allocation119_spill] sm:$0xff] %v3163_v51  ;;  %v3165_v52 = vpop.permute.xlu1 %725  ;;  %v3167_v32 = vpop.permute.xlu0 %723  ;;  %v3182_v51 = vld [vmem:[%s2277_s19 + $0x190] sm:$0x3] }
 0x13a   : > { %4754 = vst [vmem:[#allocation120_spill] sm:$0xff] %v3165_v52  ;;  %v4762_v52 = vld [vmem:[#allocation20_spill] sm:$0xff] }
 0x13b   : > { %4755 = vst [vmem:[#allocation121_spill] sm:$0xff] %v3167_v32 }
 0x13c   : > { %314 = vst.msk [vmem:[%s2303_s23 + $0xff] sm:$0x1] %vm268_vm1, %v3182_v51 }
 0x13e   : > { %855 = vrot.lane.b32.xlu2 %v4756_v15, %s2231_s27  ;;  %v4763_v15 = vld [vmem:[#allocation21_spill] sm:$0xff] }
 0x13f   : > { %853 = vrot.lane.b32.xlu1 %v4757_v40, %s2231_s27  ;;  %851 = vrot.lane.b32.xlu0 %v4758_v58, %s2231_s27  ;;  %v4764_v40 = vld [vmem:[#allocation16_spill] sm:$0xff] }
 0x140   : > { %v3175_v17 = vpop.permute.xlu2 %751 }
 0x141   : > { %4759 = vst [vmem:[#allocation122_spill] sm:$0xff] %v3175_v17  ;;  %v3177_v35 = vpop.permute.xlu1 %731  ;;  %v3179_v0 = vpop.permute.xlu0 %729  ;;  %v4769_v17 = vld [vmem:[#allocation24_spill] sm:$0xff] }
 0x142   : > { %4760 = vst [vmem:[#allocation123_spill] sm:$0xff] %v3177_v35 }
 0x143   : > { %4761 = vst [vmem:[#allocation124_spill] sm:$0xff] %v3179_v0  ;;  %v4768_v0 = vld [vmem:[#allocation23_spill] sm:$0xff] }
 0x146   : > { %861 = vrot.lane.b32.xlu2 %v4762_v52, %s2231_s27  ;;  %v4770_v52 = vld [vmem:[#allocation19_spill] sm:$0xff] }
 0x147   : > { %859 = vrot.lane.b32.xlu1 %v4763_v15, %s2231_s27  ;;  %857 = vrot.lane.b32.xlu0 %v4764_v40, %s2231_s27 }
 0x148   : > { %v3193_v58 = vpop.permute.xlu2 %757 }
 0x149   : > { %4765 = vst [vmem:[#allocation16_spill] sm:$0xff] %v3193_v58  ;;  %v3195_v32 = vpop.permute.xlu1 %737  ;;  %v3197_v35 = vpop.permute.xlu0 %735  ;;  %v4773_v58 = vld [vmem:[#allocation26_spill] sm:$0xff] }
 0x14a   : > { %4766 = vst [vmem:[#allocation125_spill] sm:$0xff] %v3195_v32  ;;  %v4774_v32 = vld [vmem:[#allocation22_spill] sm:$0xff] }
 0x14b   : > { %4767 = vst [vmem:[#allocation126_spill] sm:$0xff] %v3197_v35 }
 0x14e   : > { %867 = vrot.lane.b32.xlu2 %v4768_v0, %s2231_s27 }
 0x14f   : > { %865 = vrot.lane.b32.xlu1 %v4769_v17, %s2231_s27  ;;  %863 = vrot.lane.b32.xlu0 %v4770_v52, %s2231_s27 }
 0x150   : > { %v3205_v33 = vpop.permute.xlu2 %763 }
 0x151   : > { %v3207_v15 = vpop.permute.xlu1 %743  ;;  %v3209_v25 = vpop.permute.xlu0 %741 }
 0x152   : > { %4771 = vst [vmem:[#allocation127_spill] sm:$0xff] %v3207_v15  ;;  %v4778_v15 = vld [vmem:[#allocation29_spill] sm:$0xff] }
 0x153   : > { %4772 = vst [vmem:[#allocation128_spill] sm:$0xff] %v3209_v25  ;;  %v4779_v25 = vld [vmem:[#allocation25_spill] sm:$0xff] }
 0x156   : > { %873 = vrot.lane.b32.xlu2 %v4773_v58, %s2231_s27 }
 0x157   : > { %871 = vrot.lane.b32.xlu1 %v2684_v6, %s2231_s27  ;;  %869 = vrot.lane.b32.xlu0 %v4774_v32, %s2231_s27  ;;  %v817_v6 = vrot.slane %v3043_v5, 1  ;;  %v819_v32 = vrot.slane %v3182_v51, 1 }
 0x158   : > { %v3217_v35 = vpop.permute.xlu2 %769 }
 0x159   : > { %4775 = vst [vmem:[#allocation26_spill] sm:$0xff] %v3217_v35  ;;  %v3219_v0 = vpop.permute.xlu1 %749  ;;  %v3221_v17 = vpop.permute.xlu0 %747  ;;  %v816_v35 = vrot.slane %v3095_v3, 1 }
 0x15a   : > { %4776 = vst [vmem:[#allocation129_spill] sm:$0xff] %v3219_v0 }
 0x15b   : > { %4777 = vst [vmem:[#allocation130_spill] sm:$0xff] %v3221_v17 }
 0x15e   : > { %879 = vrot.lane.b32.xlu2 %v2714_v53, %s2231_s27  ;;  %v3239_v53 = vsel %vm363_vm0, %v817_v6, %v819_v32 }
 0x15f   : > { %877 = vrot.lane.b32.xlu1 %v4778_v15, %s2231_s27  ;;  %875 = vrot.lane.b32.xlu0 %v4779_v25, %s2231_s27  ;;  %4783 = vst [vmem:[#allocation133_spill] sm:$0xff] %v3239_v53  ;;  %v3242_v15 = vsel %vm363_vm0, %v816_v35, %v817_v6  ;;  %v4788_v6 = vld [vmem:[#allocation30_spill] sm:$0xff] }
 0x160   : > { %v3229_v52 = vpop.permute.xlu2 %775  ;;  %4784 = vst [vmem:[#allocation134_spill] sm:$0xff] %v3242_v15 }
 0x161   : > { %4780 = vst [vmem:[#allocation25_spill] sm:$0xff] %v3229_v52  ;;  %v3234_v0 = vpop.permute.xlu1 %755  ;;  %v3236_v17 = vpop.permute.xlu0 %753 }
 0x162   : > { %4781 = vst [vmem:[#allocation131_spill] sm:$0xff] %v3234_v0 }
 0x163   : > { %4782 = vst [vmem:[#allocation132_spill] sm:$0xff] %v3236_v17 }
 0x166   : > { %922 = vrot.lane.b32.xlu2 %v2732_v61, %s2232_s28 }
 0x167   : > { %883 = vrot.lane.b32.xlu1 %v3239_v53, %s2231_s27  ;;  %881 = vrot.lane.b32.xlu0 %v3242_v15, %s2231_s27  ;;  %v4792_v53 = vld [vmem:[#allocation36_spill] sm:$0xff] }
 0x168   : > { %v3250_v52 = vpop.permute.xlu2 %781  ;;  %v4793_v15 = vld [vmem:[#allocation32_spill] sm:$0xff] }
 0x169   : > { %4785 = vst [vmem:[#allocation135_spill] sm:$0xff] %v3250_v52  ;;  %v3252_v0 = vpop.permute.xlu1 %761  ;;  %v3254_v17 = vpop.permute.xlu0 %759 }
 0x16a   : > { %4786 = vst [vmem:[#allocation136_spill] sm:$0xff] %v3252_v0 }
 0x16b   : > { %4787 = vst [vmem:[#allocation137_spill] sm:$0xff] %v3254_v17 }
 0x16e   : > { %928 = vrot.lane.b32.xlu2 %v2751_v59, %s2232_s28 }
 0x16f   : > { %926 = vrot.lane.b32.xlu1 %v2754_v62, %s2232_s28  ;;  %924 = vrot.lane.b32.xlu0 %v4788_v6, %s2232_s28 }
 0x170   : > { %v3262_v61 = vpop.permute.xlu2 %825 }
 0x171   : > { %4789 = vst [vmem:[#allocation30_spill] sm:$0xff] %v3262_v61  ;;  %v3264_v32 = vpop.permute.xlu1 %767  ;;  %v3266_v35 = vpop.permute.xlu0 %765  ;;  %v4797_v61 = vld [vmem:[#allocation39_spill] sm:$0xff] }
 0x172   : > { %4790 = vst [vmem:[#allocation138_spill] sm:$0xff] %v3264_v32  ;;  %v4798_v32 = vld [vmem:[#allocation40_spill] sm:$0xff] }
 0x173   : > { %4791 = vst [vmem:[#allocation139_spill] sm:$0xff] %v3266_v35 }
 0x176   : > { %934 = vrot.lane.b32.xlu2 %v2772_v26, %s2232_s28  ;;  %v4799_v26 = vld [vmem:[#allocation34_spill] sm:$0xff] }
 0x177   : > { %932 = vrot.lane.b32.xlu1 %v4792_v53, %s2232_s28  ;;  %930 = vrot.lane.b32.xlu0 %v4793_v15, %s2232_s28 }
 0x178   : > { %v3274_v17 = vpop.permute.xlu2 %831 }
 0x179   : > { %4794 = vst [vmem:[#allocation32_spill] sm:$0xff] %v3274_v17  ;;  %v3276_v0 = vpop.permute.xlu1 %773  ;;  %v3278_v6 = vpop.permute.xlu0 %771 }
 0x17a   : > { %4795 = vst [vmem:[#allocation140_spill] sm:$0xff] %v3276_v0 }
 0x17b   : > { %4796 = vst [vmem:[#allocation141_spill] sm:$0xff] %v3278_v6 }
 0x17e   : > { %940 = vrot.lane.b32.xlu2 %v4797_v61, %s2232_s28  ;;  %v4803_v61 = vld [vmem:[#allocation38_spill] sm:$0xff] }
 0x17f   : > { %938 = vrot.lane.b32.xlu1 %v4798_v32, %s2232_s28  ;;  %936 = vrot.lane.b32.xlu0 %v4799_v26, %s2232_s28 }
 0x180   : > { %v3286_v35 = vpop.permute.xlu2 %837 }
 0x181   : > { %4800 = vst [vmem:[#allocation142_spill] sm:$0xff] %v3286_v35  ;;  %v3288_v53 = vpop.permute.xlu1 %779  ;;  %v3290_v52 = vpop.permute.xlu0 %777  ;;  %v4807_v35 = vld [vmem:[#allocation50_spill] sm:$0xff] }
 0x182   : > { %4801 = vst [vmem:[#allocation143_spill] sm:$0xff] %v3288_v53 }
 0x183   : > { %4802 = vst [vmem:[#allocation144_spill] sm:$0xff] %v3290_v52  ;;  %v4808_v52 = vld [vmem:[#allocation44_spill] sm:$0xff] }
 0x186   : > { %946 = vrot.lane.b32.xlu2 %v2819_v11, %s2232_s28 }
 0x187   : > { %944 = vrot.lane.b32.xlu1 %v2822_v48, %s2232_s28  ;;  %942 = vrot.lane.b32.xlu0 %v4803_v61, %s2232_s28 }
 0x188   : > { %v3298_v6 = vpop.permute.xlu2 %843 }
 0x189   : > { %4804 = vst [vmem:[#allocation38_spill] sm:$0xff] %v3298_v6  ;;  %v3300_v32 = vpop.permute.xlu1 %823  ;;  %v3302_v26 = vpop.permute.xlu0 %821  ;;  %v4811_v6 = vld [vmem:[#allocation48_spill] sm:$0xff] }
 0x18a   : > { %4805 = vst [vmem:[#allocation145_spill] sm:$0xff] %v3300_v32 }
 0x18b   : > { %4806 = vst [vmem:[#allocation146_spill] sm:$0xff] %v3302_v26 }
 0x18e   : > { %952 = vrot.lane.b32.xlu2 %v2845_v7, %s2232_s28 }
 0x18f   : > { %950 = vrot.lane.b32.xlu1 %v4807_v35, %s2232_s28  ;;  %948 = vrot.lane.b32.xlu0 %v4808_v52, %s2232_s28 }
 0x190   : > { %v3310_v53 = vpop.permute.xlu2 %849 }
 0x191   : > { %v3312_v0 = vpop.permute.xlu1 %829  ;;  %v3314_v17 = vpop.permute.xlu0 %827 }
 0x192   : > { %4809 = vst [vmem:[#allocation147_spill] sm:$0xff] %v3312_v0  ;;  %v4816_v0 = vld [vmem:[#allocation54_spill] sm:$0xff] }
 0x193   : > { %4810 = vst [vmem:[#allocation148_spill] sm:$0xff] %v3314_v17  ;;  %v4815_v17 = vld [vmem:[#allocation61_spill] sm:$0xff] }
 0x196   : > { %958 = vrot.lane.b32.xlu2 %v2870_v60, %s2232_s28 }
 0x197   : > { %956 = vrot.lane.b32.xlu1 %v2873_v8, %s2232_s28  ;;  %954 = vrot.lane.b32.xlu0 %v4811_v6, %s2232_s28 }
 0x198   : > { %v3322_v32 = vpop.permute.xlu2 %855 }
 0x199   : > { %4812 = vst [vmem:[#allocation149_spill] sm:$0xff] %v3322_v32  ;;  %v3324_v7 = vpop.permute.xlu1 %835  ;;  %v3326_v26 = vpop.permute.xlu0 %833 }
 0x19a   : > { %4813 = vst [vmem:[#allocation150_spill] sm:$0xff] %v3324_v7  ;;  %v4820_v7 = vld [vmem:[#allocation59_spill] sm:$0xff] }
 0x19b   : > { %4814 = vst [vmem:[#allocation151_spill] sm:$0xff] %v3326_v26 }
 0x19e   : > { %964 = vrot.lane.b32.xlu2 %v2896_v12, %s2232_s28 }
 0x19f   : > { %962 = vrot.lane.b32.xlu1 %v4815_v17, %s2232_s28  ;;  %960 = vrot.lane.b32.xlu0 %v4816_v0, %s2232_s28 }
 0x1a0   : > { %v3334_v35 = vpop.permute.xlu2 %861 }
 0x1a1   : > { %4817 = vst [vmem:[#allocation61_spill] sm:$0xff] %v3334_v35  ;;  %v3336_v8 = vpop.permute.xlu1 %841  ;;  %v3338_v6 = vpop.permute.xlu0 %839 }
 0x1a2   : > { %4818 = vst [vmem:[#allocation54_spill] sm:$0xff] %v3336_v8  ;;  %v4823_v8 = vld [vmem:[#allocation65_spill] sm:$0xff] }
 0x1a3   : > { %4819 = vst [vmem:[#allocation152_spill] sm:$0xff] %v3338_v6  ;;  %v917_v6 = vrot.slane %v3095_v3, 2 }
 0x1a6   : > { %970 = vrot.lane.b32.xlu2 %v2921_v14, %s2232_s28  ;;  %v918_v14 = vrot.slane %v3043_v5, 2 }
 0x1a7   : > { %968 = vrot.lane.b32.xlu1 %v2924_v19, %s2232_s28  ;;  %966 = vrot.lane.b32.xlu0 %v4820_v7, %s2232_s28 }
 0x1a8   : > { %v3346_v26 = vpop.permute.xlu2 %867 }
 0x1a9   : > { %4821 = vst [vmem:[#allocation153_spill] sm:$0xff] %v3346_v26  ;;  %v3348_v52 = vpop.permute.xlu1 %847  ;;  %v3350_v32 = vpop.permute.xlu0 %845 }
 0x1aa   : > { %4822 = vst [vmem:[#allocation154_spill] sm:$0xff] %v3350_v32  ;;  %v3367_v32 = vsel %vm540_vm3, %v917_v6, %v918_v14 }
 0x1ab   : > { %4825 = vst [vmem:[#allocation156_spill] sm:$0xff] %v3367_v32 }
 0x1ae   : > { %976 = vrot.lane.b32.xlu2 %v2947_v23, %s2232_s28 }
 0x1af   : > { %974 = vrot.lane.b32.xlu1 %v2950_v29, %s2232_s28  ;;  %972 = vrot.lane.b32.xlu0 %v4823_v8, %s2232_s28 }
 0x1b0   : > { %v3360_v19 = vpop.permute.xlu2 %873 }
 0x1b1   : > { %4824 = vst [vmem:[#allocation155_spill] sm:$0xff] %v3360_v19  ;;  %v3362_v7 = vpop.permute.xlu1 %853  ;;  %v3364_v26 = vpop.permute.xlu0 %851  ;;  %v920_v19 = vrot.slane %v3182_v51, 2 }
 0x1b3   : > { %v3383_v6 = vsel %vm540_vm3, %v918_v14, %v920_v19 }
 0x1b4   : > { %4827 = vst [vmem:[#allocation158_spill] sm:$0xff] %v3383_v6 }
 0x1b6   : > { %982 = vrot.lane.b32.xlu2 %v3367_v32, %s2232_s28  ;;  %v3388_v32 = vld [vmem:[%s2277_s19 + $0x30] sm:$0xff] }
 0x1b7   : > { %980 = vrot.lane.b32.xlu1 %v2966_v47, %s2232_s28  ;;  %978 = vrot.lane.b32.xlu0 %v2944_v22, %s2232_s28  ;;  %4828 = vst [vmem:[#allocation159_spill] sm:$0xff] %v3388_v32 }
 0x1b8   : > { %v3375_v8 = vpop.permute.xlu2 %879 }
 0x1b9   : > { %4826 = vst [vmem:[#allocation157_spill] sm:$0xff] %v3375_v8  ;;  %v3378_v35 = vpop.permute.xlu1 %859  ;;  %v3380_v12 = vpop.permute.xlu0 %857 }
 0x1be   : > { %1022 = vrot.lane.b32.xlu2 %v2283_v1, %s2233_s29 }
 0x1bf   : > { %1020 = vrot.lane.b32.xlu1 %v3388_v32, %s2233_s29  ;;  %984 = vrot.lane.b32.xlu0 %v3383_v6, %s2232_s28 }
 0x1c0   : > { %v3394_v51 = vpop.permute.xlu2 %922 }
 0x1c1   : > { %4829 = vst [vmem:[#allocation160_spill] sm:$0xff] %v3394_v51  ;;  %v3396_v8 = vpop.permute.xlu1 %865  ;;  %v3398_v47 = vpop.permute.xlu0 %863 }
 0x1c6   : > { %1028 = vrot.lane.b32.xlu2 %v2364_v27, %s2233_s29 }
 0x1c7   : > { %1026 = vrot.lane.b32.xlu1 %v2373_v30, %s2233_s29  ;;  %1024 = vrot.lane.b32.xlu0 %v2376_v31, %s2233_s29 }
 0x1c8   : > { %v3406_v14 = vpop.permute.xlu2 %928 }
 0x1c9   : > { %4830 = vst [vmem:[#allocation161_spill] sm:$0xff] %v3406_v14  ;;  %v3408_v19 = vpop.permute.xlu1 %871  ;;  %v3410_v32 = vpop.permute.xlu0 %869 }
 0x1ca   : > { %4831 = vst [vmem:[#allocation162_spill] sm:$0xff] %v3410_v32 }
 0x1ce   : > { %1034 = vrot.lane.b32.xlu2 %v2416_v43, %s2233_s29 }
 0x1cf   : > { %1032 = vrot.lane.b32.xlu1 %v2422_v44, %s2233_s29  ;;  %1030 = vrot.lane.b32.xlu0 %v2367_v28, %s2233_s29 }
 0x1d0   : > { %v3418_v27 = vpop.permute.xlu2 %934 }
 0x1d1   : > { %4832 = vst [vmem:[#allocation163_spill] sm:$0xff] %v3418_v27  ;;  %v3420_v30 = vpop.permute.xlu1 %877  ;;  %v3422_v31 = vpop.permute.xlu0 %875 }
 0x1d6   : > { %1040 = vrot.lane.b32.xlu2 %v2453_v54, %s2233_s29 }
 0x1d7   : > { %1038 = vrot.lane.b32.xlu1 %v2462_v56, %s2233_s29  ;;  %1036 = vrot.lane.b32.xlu0 %v2465_v57, %s2233_s29 }
 0x1d8   : > { %v3430_v43 = vpop.permute.xlu2 %940 }
 0x1d9   : > { %4833 = vst [vmem:[#allocation164_spill] sm:$0xff] %v3430_v43  ;;  %v3432_v44 = vpop.permute.xlu1 %883  ;;  %v3434_v14 = vpop.permute.xlu0 %881 }
 0x1de   : > { %1046 = vrot.lane.b32.xlu2 %v2491_v9, %s2233_s29 }
 0x1df   : > { %1044 = vrot.lane.b32.xlu1 %v2497_v10, %s2233_s29  ;;  %1042 = vrot.lane.b32.xlu0 %v2456_v55, %s2233_s29 }
 0x1e0   : > { %v3442_v54 = vpop.permute.xlu2 %946 }
 0x1e1   : > { %4834 = vst [vmem:[#allocation165_spill] sm:$0xff] %v3442_v54  ;;  %v3444_v27 = vpop.permute.xlu1 %926  ;;  %v3446_v57 = vpop.permute.xlu0 %924 }
 0x1e2   : > { %4835 = vst [vmem:[#allocation166_spill] sm:$0xff] %v3446_v57 }
 0x1e6   : > { %1052 = vrot.lane.b32.xlu2 %v2528_v37, %s2233_s29 }
 0x1e7   : > { %1050 = vrot.lane.b32.xlu1 %v2537_v45, %s2233_s29  ;;  %1048 = vrot.lane.b32.xlu0 %v2540_v46, %s2233_s29 }
 0x1e8   : > { %v3454_v43 = vpop.permute.xlu2 %952 }
 0x1e9   : > { %v3456_v10 = vpop.permute.xlu1 %932  ;;  %v3458_v28 = vpop.permute.xlu0 %930 }
 0x1ea   : > { %4836 = vst [vmem:[#allocation167_spill] sm:$0xff] %v3458_v28 }
 0x1ee   : > { %1058 = vrot.lane.b32.xlu2 %v2569_v20, %s2233_s29 }
 0x1ef   : > { %1056 = vrot.lane.b32.xlu1 %v2572_v21, %s2233_s29  ;;  %1054 = vrot.lane.b32.xlu0 %v2531_v38, %s2233_s29 }
 0x1f0   : > { %v3466_v37 = vpop.permute.xlu2 %958 }
 0x1f1   : > { %v3468_v54 = vpop.permute.xlu1 %938  ;;  %v3470_v46 = vpop.permute.xlu0 %936 }
 0x1f2   : > { %4837 = vst [vmem:[#allocation168_spill] sm:$0xff] %v3468_v54  ;;  %v3505_v54 = vld [vmem:[%s2277_s19 + $0x1a0] sm:$0xff] }
 0x1f3   : > { %4838 = vst [vmem:[#allocation169_spill] sm:$0xff] %v3470_v46 }
 0x1f6   : > { %1064 = vrot.lane.b32.xlu2 %v2594_v16, %s2233_s29 }
 0x1f7   : > { %1062 = vrot.lane.b32.xlu1 %v2600_v36, %s2233_s29  ;;  %1060 = vrot.lane.b32.xlu0 %v2603_v34, %s2233_s29 }
 0x1f8   : > { %v3478_v21 = vpop.permute.xlu2 %964 }
 0x1f9   : > { %v3480_v57 = vpop.permute.xlu1 %944  ;;  %v3482_v32 = vpop.permute.xlu0 %942 }
 0x1fa   : > { %4839 = vst [vmem:[#allocation170_spill] sm:$0xff] %v3480_v57 }
 0x1fb   : > { %4840 = vst [vmem:[#allocation171_spill] sm:$0xff] %v3482_v32 }
 0x1fe   : > { %1070 = vrot.lane.b32.xlu2 %v2638_v50, %s2233_s29 }
 0x1ff   : > { %1068 = vrot.lane.b32.xlu1 %v2644_v49, %s2233_s29  ;;  %1066 = vrot.lane.b32.xlu0 %v2597_v63, %s2233_s29 }
 0x200   : > { %v3490_v16 = vpop.permute.xlu2 %970 }
 0x201   : > { %4841 = vst [vmem:[#allocation172_spill] sm:$0xff] %v3490_v16  ;;  %v3492_v34 = vpop.permute.xlu1 %950  ;;  %v949_v46 = vpop.permute.xlu0 %948  ;;  %v3508_v16 = vld [vmem:[%s2277_s19 + $0x198] sm:$0xff] }
 0x206   : > { %1076 = vrot.lane.b32.xlu2 %v3095_v3, %s2233_s29 }
 0x207   : > { %1074 = vrot.lane.b32.xlu1 %v2690_v4, %s2233_s29  ;;  %1072 = vrot.lane.b32.xlu0 %v2693_v39, %s2233_s29 }
 0x208   : > { %v3500_v57 = vpop.permute.xlu2 %976 }
 0x209   : > { %v3502_v49 = vpop.permute.xlu1 %956  ;;  %v955_v32 = vpop.permute.xlu0 %954 }
 0x20e   : > { %1082 = vrot.lane.b32.xlu2 %v3505_v54, %s2233_s29 }
 0x20f   : > { %1080 = vrot.lane.b32.xlu1 %v3508_v16, %s2233_s29  ;;  %1078 = vrot.lane.b32.xlu0 %v3043_v5, %s2233_s29 }
 0x210   : > { %v3516_v3 = vpop.permute.xlu2 %982 }
 0x211   : > { %4842 = vst [vmem:[#allocation173_spill] sm:$0xff] %v3516_v3  ;;  %v3518_v39 = vpop.permute.xlu1 %962  ;;  %v3520_v28 = vpop.permute.xlu0 %960 }
 0x216   : > { %1126 = vrot.lane.b32.xlu2 %v2413_v42, %s2234_s30 }
 0x217   : > { %1124 = vrot.lane.b32.xlu1 %v2354_v24, %s2234_s30  ;;  %1122 = vrot.lane.b32.xlu0 %v2312_v13, %s2234_s30 }
 0x218   : > { %v3528_v51 = vpop.permute.xlu2 %1022 }
 0x219   : > { %4843 = vst [vmem:[#allocation174_spill] sm:$0xff] %v3528_v51  ;;  %v3530_v6 = vpop.permute.xlu1 %968  ;;  %v3532_v5 = vpop.permute.xlu0 %966  ;;  %v4847_v51 = vld [vmem:[#allocation12_spill] sm:$0xff] }
 0x21e   : > { %1132 = vrot.lane.b32.xlu2 %v4739_v18, %s2234_s30 }
 0x21f   : > { %1130 = vrot.lane.b32.xlu1 %v4740_v2, %s2234_s30  ;;  %1128 = vrot.lane.b32.xlu0 %v2410_v41, %s2234_s30 }
 0x220   : > { %v3540_v42 = vpop.permute.xlu2 %1028 }
 0x221   : > { %4844 = vst [vmem:[#allocation175_spill] sm:$0xff] %v3540_v42  ;;  %v3542_v24 = vpop.permute.xlu1 %974  ;;  %v3544_v13 = vpop.permute.xlu0 %972 }
 0x226   : > { %1255 = vrot.lane.b32.xlu2 %v2870_v60, %s2235_s4 }
 0x227   : > { %1170 = vrot.lane.b32.xlu1 %v4773_v58, %s2234_s30  ;;  %1154 = vrot.lane.b32.xlu0 %v4764_v40, %s2234_s30 }
 0x228   : > { %v3552_v18 = vpop.permute.xlu2 %1034 }
 0x229   : > { %4845 = vst [vmem:[#allocation176_spill] sm:$0xff] %v3552_v18  ;;  %v3554_v2 = vpop.permute.xlu1 %980  ;;  %v3556_v41 = vpop.permute.xlu0 %978  ;;  %v4849_v18 = vld [vmem:[#allocation63_spill] sm:$0xff] }
 0x22a   : > { %4846 = vst [vmem:[#allocation177_spill] sm:$0xff] %v3554_v2  ;;  %v1332_v42 = vsel %vm266_vm2, %v2462_v56, %v4849_v18  ;;  %v4850_v2 = vld [vmem:[#allocation101_spill] sm:$0xff] }
 0x22e   : > { %1223 = vrot.lane.b32.xlu2 %v2754_v62, %s2235_s4  ;;  %v1365_v62 = vsel %vm1351_vm4, %v1332_v42, %v4850_v2 }
 0x22f   : > { %1138 = vrot.lane.b32.xlu1 %v4847_v51, %s2234_s30  ;;  %1271 = vrot.lane.b32.xlu0 %v2950_v29, %s2235_s4  ;;  %v4851_v51 = vld [vmem:[#allocation119_spill] sm:$0xff] }
 0x230   : > { %v3564_v60 = vpop.permute.xlu2 %1040  ;;  %v1398_v3 = vsel %vm1384_vm5, %v1365_v62, %v4851_v51  ;;  %v3594_v62 = vld [vmem:[%s2277_s19 + $0xc0] sm:$0xff] }
 0x231   : > { %4848 = vst [vmem:[#allocation12_spill] sm:$0xff] %v3564_v60  ;;  %v3566_v58 = vpop.permute.xlu1 %1020  ;;  %v3568_v40 = vpop.permute.xlu0 %984  ;;  %v1431_v29 = vsel %vm1417_vm6, %v1398_v3, %v3348_v52  ;;  %v4852_v60 = vld [vmem:[#allocation21_spill] sm:$0xff]  ;;  %v4856_v51 = vld [vmem:[#allocation122_spill] sm:$0xff] }
 0x232   : > { %v1464_v56 = vsel %vm1450_vm7, %v1431_v29, %v949_v46  ;;  %4853 = vst [vmem:[#allocation63_spill] sm:$0xff] %v3594_v62  ;;  %v4854_v52 = vld [vmem:[#allocation69_spill] sm:$0xff]  ;;  %v4857_v29 = vld [vmem:[#allocation11_spill] sm:$0xff] }
 0x233   : > { %v1335_v3 = vsel %vm266_vm2, %v3594_v62, %v4854_v52  ;;  %v4874_v62 = vld [vmem:[#allocation130_spill] sm:$0xff] }
 0x236   : > { %1172 = vrot.lane.b32.xlu2 %v4779_v25, %s2234_s30 }
 0x237   : > { %1156 = vrot.lane.b32.xlu1 %v4852_v60, %s2234_s30  ;;  %1239 = vrot.lane.b32.xlu0 %v4803_v61, %s2235_s4  ;;  %v4855_v60 = vld [vmem:[#allocation104_spill] sm:$0xff] }
 0x238   : > { %v1047_v42 = vpop.permute.xlu2 %1046  ;;  %v1368_v61 = vsel %vm1351_vm4, %v1335_v3, %v4855_v60 }
 0x239   : > { %v3586_v18 = vpop.permute.xlu1 %1026  ;;  %v3589_v2 = vsel %vm1483_vm8, %v1464_v56, %v1047_v42  ;;  %v3591_v25 = vpop.permute.xlu0 %1024  ;;  %v1401_v46 = vsel %vm1384_vm5, %v1368_v61, %v4856_v51  ;;  %v4858_v51 = vld [vmem:[#allocation72_spill] sm:$0xff] }
 0x23a   : > { %v1434_v56 = vsel %vm1417_vm6, %v1401_v46, %v3362_v7  ;;  %v1338_v7 = vsel %vm266_vm2, %v2537_v45, %v4858_v51  ;;  %v4859_v46 = vld [vmem:[#allocation108_spill] sm:$0xff] }
 0x23b   : > { %v1467_v42 = vsel %vm1450_vm7, %v1434_v56, %v955_v32  ;;  %v4861_v32 = vld [vmem:[#allocation20_spill] sm:$0xff] }
 0x23e   : > { %1140 = vrot.lane.b32.xlu2 %v4857_v29, %s2234_s30  ;;  %v4860_v29 = vld [vmem:[#allocation16_spill] sm:$0xff] }
 0x23f   : > { %1273 = vrot.lane.b32.xlu1 %v2947_v23, %s2235_s4  ;;  %1257 = vrot.lane.b32.xlu0 %v4816_v0, %s2235_s4  ;;  %v1371_v23 = vsel %vm1351_vm4, %v1338_v7, %v4859_v46  ;;  %v3644_v46 = vld [vmem:[%s2277_s19 + $0x108] sm:$0xff] }
 0x240   : > { %v1053_v52 = vpop.permute.xlu2 %1052  ;;  %v1404_v0 = vsel %vm1384_vm5, %v1371_v23, %v4860_v29  ;;  %4862 = vst [vmem:[#allocation101_spill] sm:$0xff] %v3644_v46  ;;  %v4864_v23 = vld [vmem:[#allocation111_spill] sm:$0xff] }
 0x241   : > { %v3612_v3 = vpop.permute.xlu1 %1032  ;;  %v3615_v60 = vsel %vm1483_vm8, %v1467_v42, %v1053_v52  ;;  %v3617_v61 = vpop.permute.xlu0 %1030  ;;  %v1437_v56 = vsel %vm1417_vm6, %v1404_v0, %v3378_v35  ;;  %v4863_v35 = vld [vmem:[#allocation76_spill] sm:$0xff]  ;;  %v4865_v0 = vld [vmem:[#allocation29_spill] sm:$0xff] }
 0x242   : > { %v1470_v45 = vsel %vm1450_vm7, %v1437_v56, %v3520_v28 }
 0x246   : > { %1158 = vrot.lane.b32.xlu2 %v4861_v32, %s2234_s30 }
 0x247   : > { %1241 = vrot.lane.b32.xlu1 %v2822_v48, %s2235_s4  ;;  %1225 = vrot.lane.b32.xlu0 %v2751_v59, %s2235_s4  ;;  %v1341_v48 = vsel %vm266_vm2, %v3644_v46, %v4863_v35  ;;  %v3674_v35 = vld [vmem:[%s2277_s19 + $0xa8] sm:$0xff] }
 0x248   : > { %v1059_v42 = vpop.permute.xlu2 %1058  ;;  %v1374_v59 = vsel %vm1351_vm4, %v1341_v48, %v4864_v23  ;;  %v4868_v23 = vld [vmem:[#allocation70_spill] sm:$0xff]  ;;  %285 = vst.msk [vmem:[%s2303_s23 + $0x5f] sm:$0xfe] %vm264_vm13, %v3674_v35 }
 0x249   : > { %v3636_v52 = vpop.permute.xlu1 %1038  ;;  %v3639_v51 = vsel %vm1483_vm8, %v1470_v45, %v1059_v42  ;;  %v3641_v7 = vpop.permute.xlu0 %1036  ;;  %v1407_v28 = vsel %vm1384_vm5, %v1374_v59, %v3205_v33  ;;  %v4869_v59 = vld [vmem:[#allocation114_spill] sm:$0xff] }
 0x24a   : > { %v1440_v29 = vsel %vm1417_vm6, %v1407_v28, %v3396_v8 }
 0x24b   : > { %v1473_v32 = vsel %vm1450_vm7, %v1440_v29, %v3532_v5  ;;  %v1334_v5 = vsel %vm266_vm2, %v2456_v55, %v4868_v23  ;;  %v4870_v29 = vld [vmem:[#allocation90_spill] sm:$0xff] }
 0x24e   : > { %1275 = vrot.lane.b32.xlu2 %v2944_v22, %s2235_s4  ;;  %v4866_v22 = vld [vmem:[#allocation79_spill] sm:$0xff] }
 0x24f   : > { %1259 = vrot.lane.b32.xlu1 %v4815_v17, %s2235_s4  ;;  %1174 = vrot.lane.b32.xlu0 %v4865_v0, %s2234_s30  ;;  %v1344_v8 = vsel %vm266_vm2, %v2600_v36, %v4866_v22  ;;  %v4867_v17 = vld [vmem:[#allocation45_spill] sm:$0xff]  ;;  %v1367_v0 = vsel %vm1351_vm4, %v1334_v5, %v4870_v29  ;;  %v4872_v36 = vld [vmem:[#allocation26_spill] sm:$0xff] }
 0x250   : > { %v1065_v56 = vpop.permute.xlu2 %1064  ;;  %v1333_v48 = vsel %vm266_vm2, %v3674_v35, %v4867_v17  ;;  %v1377_v28 = vsel %vm1351_vm4, %v1344_v8, %v4869_v59  ;;  %v4873_v17 = vld [vmem:[#allocation129_spill] sm:$0xff] }
 0x251   : > { %v3663_v45 = vpop.permute.xlu1 %1044  ;;  %v3666_v33 = vsel %vm1483_vm8, %v1473_v32, %v1065_v56  ;;  %v3668_v42 = vpop.permute.xlu0 %1042  ;;  %v4871_v32 = vld [vmem:[#allocation100_spill] sm:$0xff]  ;;  %v1410_v22 = vsel %vm1384_vm5, %v1377_v28, %v4872_v36  ;;  %v1400_v46 = vsel %vm1384_vm5, %v1367_v0, %v4873_v17  ;;  %v4877_v0 = vld [vmem:[#allocation51_spill] sm:$0xff] }
 0x252   : > { %v1366_v56 = vsel %vm1351_vm4, %v1333_v48, %v4871_v32  ;;  %v1443_v8 = vsel %vm1417_vm6, %v1410_v22, %v3408_v19  ;;  %v4875_v48 = vld [vmem:[#allocation10_spill] sm:$0xff]  ;;  %v1433_v23 = vsel %vm1417_vm6, %v1400_v46, %v3364_v26  ;;  %v3722_v46 = vld [vmem:[%s2277_s19 + $0x150] sm:$0xff]  ;;  %v3731_v32 = vld [vmem:[%s2277_s19 + $0xd8] sm:$0xff] }
 0x253   : > { %v1399_v55 = vsel %vm1384_vm5, %v1366_v56, %v4874_v62  ;;  %v1476_v5 = vsel %vm1450_vm7, %v1443_v8, %v3544_v13  ;;  %v1466_v19 = vsel %vm1450_vm7, %v1433_v23, %v3454_v43  ;;  %v4876_v13 = vld [vmem:[#allocation82_spill] sm:$0xff]  ;;  %v4878_v56 = vld [vmem:[#allocation73_spill] sm:$0xff]  ;;  %v4879_v22 = vld [vmem:[#allocation115_spill] sm:$0xff]  ;;  %291 = vst.msk [vmem:[%s2303_s23 + $0x7f] sm:$0xfe] %vm264_vm13, %v3731_v32 }
 0x254   : > { %v1347_v43 = vsel %vm266_vm2, %v3722_v46, %v4876_v13  ;;  %v1337_v36 = vsel %vm266_vm2, %v3731_v32, %v4878_v56  ;;  %v4882_v23 = vld [vmem:[#allocation25_spill] sm:$0xff]  ;;  %v4886_v13 = vld [vmem:[#allocation28_spill] sm:$0xff]  ;;  %306 = vst.msk [vmem:[%s2303_s23 + $0xcf] sm:$0xfe] %vm264_vm13, %v3722_v46 }
 0x255   : > { %v1380_v17 = vsel %vm1351_vm4, %v1347_v43, %v4879_v22  ;;  %v4887_v43 = vld [vmem:[#allocation19_spill] sm:$0xff] }
 0x256   : > { %1243 = vrot.lane.b32.xlu2 %v2819_v11, %s2235_s4  ;;  %v1432_v11 = vsel %vm1417_vm6, %v1399_v55, %v3310_v53  ;;  %v4880_v55 = vld [vmem:[#allocation93_spill] sm:$0xff] }
 0x257   : > { %1227 = vrot.lane.b32.xlu1 %v4793_v15, %s2235_s4  ;;  %1142 = vrot.lane.b32.xlu0 %v4875_v48, %s2234_s30  ;;  %v1465_v15 = vsel %vm1450_vm7, %v1432_v11, %v3492_v34  ;;  %v1336_v34 = vsel %vm266_vm2, %v2491_v9, %v4877_v0  ;;  %v1370_v8 = vsel %vm1351_vm4, %v1337_v36, %v4880_v55  ;;  %v4881_v48 = vld [vmem:[#allocation103_spill] sm:$0xff]  ;;  %v4883_v9 = vld [vmem:[#allocation60_spill] sm:$0xff]  ;;  %v4888_v0 = vld [vmem:[#allocation149_spill] sm:$0xff] }
 0x258   : > { %v1071_v62 = vpop.permute.xlu2 %1070  ;;  %v1369_v11 = vsel %vm1351_vm4, %v1336_v34, %v4881_v48 }
 0x259   : > { %v1051_v59 = vpop.permute.xlu1 %1050  ;;  %v3713_v28 = vsel %vm1483_vm8, %v1476_v5, %v1071_v62  ;;  %v1049_v29 = vpop.permute.xlu0 %1048  ;;  %v1413_v5 = vsel %vm1384_vm5, %v1380_v17, %v4882_v23  ;;  %v4884_v62 = vld [vmem:[#allocation131_spill] sm:$0xff] }
 0x25a   : > { %v3716_v53 = vsel %vm1483_vm8, %v1466_v19, %v1051_v59  ;;  %v3719_v26 = vsel %vm1483_vm8, %v1465_v15, %v1049_v29  ;;  %v1403_v19 = vsel %vm1384_vm5, %v1370_v8, %v4884_v62  ;;  %v4885_v15 = vld [vmem:[#allocation132_spill] sm:$0xff]  ;;  %v1446_v29 = vsel %vm1417_vm6, %v1413_v5, %v3420_v30 }
 0x25b   : > { %v1402_v59 = vsel %vm1384_vm5, %v1369_v11, %v4885_v15  ;;  %v1436_v56 = vsel %vm1417_vm6, %v1403_v19, %v3380_v12  ;;  %v1479_v36 = vsel %vm1450_vm7, %v1446_v29, %v3556_v41  ;;  %v1586_v41 = vld [vmem:[%s4531_s1 + $0x20] sm:$0xf]  ;;  %v3785_v5 = vld [vmem:[%s2277_s19 + $0xf0] sm:$0xff]  ;;  %v4891_v19 = vld [vmem:[#allocation77_spill] sm:$0xff] }
 0x25c   : > { %v1435_v34 = vsel %vm1417_vm6, %v1402_v59, %v4888_v0  ;;  %v1469_v30 = vsel %vm1450_vm7, %v1436_v56, %v3466_v37  ;;  %v1585_v37 = vld [vmem:[%s4531_s1 + $0x18] sm:$0xff]  ;;  %2102 = vmatpush.msk.msra.mxu0 %vm1688_vm9, %v1586_v41  ;;  %2139 = vmatpush.msk.msra.mxu2 %vm1688_vm9, %v1586_v41  ;;  %v1340_v15 = vsel %vm266_vm2, %v2531_v38, %v4891_v19  ;;  %v4892_v59 = vld [vmem:[#allocation118_spill] sm:$0xff]  ;;  %v4894_v0 = vld [vmem:[#allocation107_spill] sm:$0xff] }
 0x25d   : > { %v1468_v17 = vsel %vm1450_vm7, %v1435_v34, %v3502_v49  ;;  %v4889_v49 = vld [vmem:[#allocation85_spill] sm:$0xff]  ;;  %2140 = vmatpush.msk.msra.mxu3 %vm1688_vm9, %v1586_v41  ;;  %2138 = vmatpush.msk.msra.mxu1 %vm1688_vm9, %v1586_v41  ;;  %v4895_v56 = vld [vmem:[#allocation135_spill] sm:$0xff]  ;;  %v4896_v38 = vld [vmem:[#allocation36_spill] sm:$0xff]  ;;  %294 = vst.msk [vmem:[%s2303_s23 + $0x8f] sm:$0xfe] %vm264_vm13, %v3785_v5 }
 0x25e   : > { %1261 = vrot.lane.b32.xlu2 %v4883_v9, %s2235_s4  ;;  %v1350_v23 = vsel %vm266_vm2, %v2690_v4, %v4889_v49  ;;  %v4890_v9 = vld [vmem:[#allocation56_spill] sm:$0xff]  ;;  %1704 = vmatpush.msra.mxu0 %v1585_v37  ;;  %v4899_v41 = vld [vmem:[#allocation15_spill] sm:$0xff]  ;;  %v4900_v49 = vld [vmem:[#allocation74_spill] sm:$0xff] }
 0x25f   : > { %1176 = vrot.lane.b32.xlu1 %v4886_v13, %s2234_s30  ;;  %1160 = vrot.lane.b32.xlu0 %v4887_v43, %s2234_s30  ;;  %v1339_v62 = vsel %vm266_vm2, %v3785_v5, %v4890_v9  ;;  %v1383_v29 = vsel %vm1351_vm4, %v1350_v23, %v4892_v59  ;;  %v1584_v4 = vld [vmem:[%s4531_s1 + $0x10] sm:$0xff]  ;;  %v1583_v23 = vld [vmem:[%s4531_s1 + $0x8] sm:$0xff]  ;;  %v4901_v9 = vld [vmem:[#allocation61_spill] sm:$0xff] }
 0x260   : > { %v1077_v22 = vpop.permute.xlu2 %1076  ;;  %2142 = vmatpush.msra.mxu2 %v1585_v37  ;;  %v4893_v13 = vld [vmem:[#allocation96_spill] sm:$0xff]  ;;  %v1372_v34 = vsel %vm1351_vm4, %v1339_v62, %v4894_v0  ;;  %2143 = vmatpush.msra.mxu3 %v1585_v37 }
 0x261   : > { %v1057_v55 = vpop.permute.xlu1 %1056  ;;  %v3767_v8 = vsel %vm1483_vm8, %v1479_v36, %v1077_v22  ;;  %v1055_v48 = vpop.permute.xlu0 %1054  ;;  %v1373_v43 = vsel %vm1351_vm4, %v1340_v15, %v4893_v13  ;;  %v1416_v36 = vsel %vm1384_vm5, %v1383_v29, %v4895_v56  ;;  %v4897_v22 = vld [vmem:[#allocation136_spill] sm:$0xff]  ;;  %1705 = vmatpush.msra.mxu0 %v1584_v4  ;;  %2141 = vmatpush.msra.mxu1 %v1585_v37  ;;  %v4903_v37 = vld [vmem:[#allocation62_spill] sm:$0xff] }
 0x262   : > { %v3770_v11 = vsel %vm1483_vm8, %v1469_v30, %v1057_v55  ;;  %v3773_v12 = vsel %vm1483_vm8, %v1468_v17, %v1055_v48  ;;  %v1406_v30 = vsel %vm1384_vm5, %v1373_v43, %v4897_v22  ;;  %v4898_v17 = vld [vmem:[#allocation137_spill] sm:$0xff]  ;;  %v1449_v48 = vsel %vm1417_vm6, %v1416_v36, %v3432_v44  ;;  %2145 = vmatpush.msra.mxu2 %v1584_v4 }
 0x263   : > { %v1405_v55 = vsel %vm1384_vm5, %v1372_v34, %v4898_v17  ;;  %v1439_v19 = vsel %vm1417_vm6, %v1406_v30, %v3398_v47  ;;  %v1482_v15 = vsel %vm1450_vm7, %v1449_v48, %v3568_v40  ;;  %2146 = vmatpush.msra.mxu3 %v1584_v4  ;;  %1706 = vmatpush.msra.mxu0 %v1583_v23  ;;  %v4902_v34 = vld [vmem:[#allocation42_spill] sm:$0xff] }
 0x264   : > { %v1438_v62 = vsel %vm1417_vm6, %v1405_v55, %v4901_v9  ;;  %v1472_v59 = vsel %vm1450_vm7, %v1439_v19, %v3478_v21  ;;  %v1582_v21 = vld [vmem:[%s4531_s1] sm:$0xff]  ;;  %2148 = vmatpush.msra.mxu2 %v1583_v23  ;;  %2144 = vmatpush.msra.mxu1 %v1584_v4  ;;  %v1342_v36 = vsel %vm266_vm2, %v2569_v20, %v4903_v37  ;;  %v4906_v55 = vld [vmem:[#allocation121_spill] sm:$0xff]  ;;  %v1118_v20 = vrot.slane %v3505_v54, 1 }
 0x265   : > { %v1471_v29 = vsel %vm1450_vm7, %v1438_v62, %v3518_v39  ;;  %v3842_v39 = vld [vmem:[%s2277_s19 + $0x18] sm:$0xff]  ;;  %2149 = vmatpush.msra.mxu3 %v1583_v23  ;;  %1707 = vmatpush.msra.mxu0 %v1582_v21  ;;  %v4905_v30 = vld [vmem:[#allocation110_spill] sm:$0xff]  ;;  %v4909_v62 = vld [vmem:[#allocation139_spill] sm:$0xff] }
 0x266   : > { %1229 = vrot.lane.b32.xlu2 %v4896_v38, %s2235_s4  ;;  %v1321_v56 = vsel %vm266_vm2, %v3842_v39, %v4902_v34  ;;  %v4904_v38 = vld [vmem:[#allocation88_spill] sm:$0xff]  ;;  %2151 = vmatpush.msra.mxu2 %v1582_v21  ;;  %v1375_v17 = vsel %vm1351_vm4, %v1342_v36, %v4905_v30  ;;  %v4908_v9 = vld [vmem:[#allocation134_spill] sm:$0xff]  ;;  %v3895_v30 = vld [vmem:[%s2277_s19 + $0x138] sm:$0xff]  ;;  %265 = vst.msk [vmem:[%s2303_s23 - $0x1] sm:$0xfe] %vm264_vm13, %v3842_v39 }
 0x267   : > { %1144 = vrot.lane.b32.xlu1 %v4899_v41, %s2234_s30  ;;  %1277 = vrot.lane.b32.xlu0 %v4900_v49, %s2235_s4  ;;  %v1354_v22 = vsel %vm1351_vm4, %v1321_v56, %v4904_v38  ;;  %v4907_v41 = vld [vmem:[#allocation30_spill] sm:$0xff]  ;;  %v1117_v49 = vrot.slane %v3508_v16, 1  ;;  %v1408_v19 = vsel %vm1384_vm5, %v1375_v17, %v4909_v62  ;;  %v4915_v17 = vld [vmem:[#allocation68_spill] sm:$0xff]  ;;  %v5026_v39 = vld [vmem:[#allocation63_spill] sm:$0xff]  ;;  %303 = vst.msk [vmem:[%s2303_s23 + $0xbf] sm:$0xfe] %vm264_vm13, %v3895_v30 }
 0x268   : > { %v1083_v44 = vpop.permute.xlu2 %1082  ;;  %v1387_v48 = vsel %vm1384_vm5, %v1354_v22, %v4906_v55  ;;  %2152 = vmatpush.msra.mxu3 %v1582_v21  ;;  %2147 = vmatpush.msra.mxu1 %v1583_v23  ;;  %v4910_v23 = vld [vmem:[#allocation24_spill] sm:$0xff]  ;;  %v4914_v22 = vld [vmem:[#allocation91_spill] sm:$0xff]  ;;  %v1345_v55 = vsel %vm266_vm2, %v3895_v30, %v4915_v17  ;;  %288 = vst.msk [vmem:[%s2303_s23 + $0x6f] sm:$0xfe] %vm264_vm13, %v5026_v39 }
 0x269   : > { %v1063_v13 = vpop.permute.xlu1 %1062  ;;  %v3830_v43 = vsel %vm1483_vm8, %v1482_v15, %v1083_v44  ;;  %v1061_v0 = vpop.permute.xlu0 %1060  ;;  %v1420_v4 = vsel %vm1417_vm6, %v1387_v48, %v4907_v41  ;;  %v4911_v44 = vld [vmem:[#allocation44_spill] sm:$0xff]  ;;  %v3887_v38 = vsel %vm363_vm0, %v1117_v49, %v1118_v20  ;;  %v4916_v48 = vld [vmem:[#allocation83_spill] sm:$0xff] }
 0x26a   : > { %v3833_v47 = vsel %vm1483_vm8, %v1472_v59, %v1063_v13  ;;  %v3836_v40 = vsel %vm1483_vm8, %v1471_v29, %v1061_v0  ;;  %v1453_v15 = vsel %vm1450_vm7, %v1420_v4, %v3444_v27  ;;  %v4912_v59 = vld [vmem:[#allocation153_spill] sm:$0xff]  ;;  %2150 = vmatpush.msra.mxu1 %v1582_v21  ;;  %v1346_v41 = vsel %vm266_vm2, %v2597_v63, %v4916_v48  ;;  %v4917_v4 = vld [vmem:[#allocation124_spill] sm:$0xff] }
 0x26b   : > { %v1441_v29 = vsel %vm1417_vm6, %v1408_v19, %v4912_v59  ;;  %v1486_v13 = vsel %vm1483_vm8, %v1453_v15, %v3591_v25  ;;  %v4913_v25 = vld [vmem:[#allocation33_spill] sm:$0xff]  ;;  %v4920_v15 = vld [vmem:[#allocation32_spill] sm:$0xff] }
 0x26c   : > { %v1474_v34 = vsel %vm1450_vm7, %v1441_v29, %v3530_v6  ;;  %v1324_v21 = vsel %vm266_vm2, %v2283_v1, %v4913_v25  ;;  %v4919_v1 = vld [vmem:[#allocation113_spill] sm:$0xff]  ;;  %v4922_v59 = vld [vmem:[#allocation140_spill] sm:$0xff]  ;;  %v4926_v25 = vld [vmem:[#allocation155_spill] sm:$0xff] }
 0x26d   : > { %v1357_v6 = vsel %vm1351_vm4, %v1324_v21, %v4914_v22  ;;  %v1378_v19 = vsel %vm1351_vm4, %v1345_v55, %v4919_v1  ;;  %v4928_v1 = vld [vmem:[#allocation86_spill] sm:$0xff] }
 0x26e   : > { %1178 = vrot.lane.b32.xlu2 %v4908_v9, %s2234_s30  ;;  %v1390_v49 = vsel %vm1384_vm5, %v1357_v6, %v4917_v4  ;;  %v4918_v9 = vld [vmem:[#allocation102_spill] sm:$0xff] }
 0x26f   : > { %1162 = vrot.lane.b32.xlu1 %v4910_v23, %s2234_s30  ;;  %1245 = vrot.lane.b32.xlu0 %v4911_v44, %s2235_s4  ;;  %v1379_v62 = vsel %vm1351_vm4, %v1346_v41, %v4918_v9  ;;  %v1423_v23 = vsel %vm1417_vm6, %v1390_v49, %v4920_v15  ;;  %v4921_v44 = vld [vmem:[#allocation14_spill] sm:$0xff]  ;;  %v1218_v49 = vrot.slane %v3508_v16, 2  ;;  %v1219_v9 = vrot.slane %v3505_v54, 2 }
 0x270   : > { %v1127_v0 = vpop.permute.xlu2 %1126  ;;  %v1412_v29 = vsel %vm1384_vm5, %v1379_v62, %v4922_v59  ;;  %v4927_v62 = vld [vmem:[#allocation71_spill] sm:$0xff]  ;;  %v4929_v15 = vld [vmem:[#allocation106_spill] sm:$0xff] }
 0x271   : > { %v3876_v56 = vpop.permute.xlu1 %1068  ;;  %v3879_v27 = vsel %vm1516_vm10, %v1486_v13, %v1127_v0  ;;  %v1067_v37 = vpop.permute.xlu0 %1066  ;;  %v4923_v13 = vld [vmem:[#allocation141_spill] sm:$0xff]  ;;  %v1456_v0 = vsel %vm1450_vm7, %v1423_v23, %v3456_v10  ;;  %v1445_v22 = vsel %vm1417_vm6, %v1412_v29, %v3422_v31  ;;  %v4931_v59 = vld [vmem:[#allocation23_spill] sm:$0xff] }
 0x272   : > { %v3882_v36 = vsel %vm1483_vm8, %v1474_v34, %v1067_v37  ;;  %v1411_v63 = vsel %vm1384_vm5, %v1378_v19, %v4923_v13  ;;  %v4924_v34 = vld [vmem:[#allocation156_spill] sm:$0xff]  ;;  %v4925_v37 = vld [vmem:[#allocation59_spill] sm:$0xff]  ;;  %v1489_v6 = vsel %vm1483_vm8, %v1456_v0, %v3617_v61  ;;  %v1478_v10 = vsel %vm1450_vm7, %v1445_v22, %v3500_v57  ;;  %v4930_v23 = vld [vmem:[#allocation5_spill] sm:$0xff] }
 0x273   : > { %v1444_v21 = vsel %vm1417_vm6, %v1411_v63, %v4926_v25  ;;  %v1348_v57 = vsel %vm266_vm2, %v2638_v50, %v4927_v62  ;;  %v1220_v50 = vsel %vm540_vm3, %v1218_v49, %v1219_v9  ;;  %v4932_v29 = vld [vmem:[#allocation143_spill] sm:$0xff]  ;;  %v4933_v63 = vld [vmem:[#allocation144_spill] sm:$0xff]  ;;  %v4936_v25 = vld [vmem:[#allocation157_spill] sm:$0xff] }
 0x274   : > { %v1477_v55 = vsel %vm1450_vm7, %v1444_v21, %v3542_v24  ;;  %v3948_v24 = vld [vmem:[%s2277_s19 + $0x168] sm:$0xff] }
 0x275   : > { %v1349_v19 = vsel %vm266_vm2, %v3948_v24, %v4928_v1  ;;  %v2197_v1 = vld [vmem:[%s2277_s19] sm:$0xff]  ;;  %309 = vst.msk [vmem:[%s2303_s23 + $0xdf] sm:$0xfe] %vm264_vm13, %v3948_v24 }
 0x276   : > { %1146 = vrot.lane.b32.xlu2 %v4921_v44, %s2234_s30  ;;  %v1382_v16 = vsel %vm1351_vm4, %v1349_v19, %v4929_v15  ;;  %v1381_v44 = vsel %vm1351_vm4, %v1348_v57, %v4930_v23  ;;  %v4939_v19 = vld [vmem:[#allocation43_spill] sm:$0xff]  ;;  %v4941_v23 = vld [vmem:[#allocation117_spill] sm:$0xff] }
 0x277   : > { %1279 = vrot.lane.b32.xlu1 %v4924_v34, %s2235_s4  ;;  %1263 = vrot.lane.b32.xlu0 %v4925_v37, %s2235_s4  ;;  %v1415_v13 = vsel %vm1384_vm5, %v1382_v16, %v4932_v29  ;;  %v1414_v0 = vsel %vm1384_vm5, %v1381_v44, %v4933_v63  ;;  %v4934_v34 = vld [vmem:[#allocation50_spill] sm:$0xff]  ;;  %v4935_v37 = vld [vmem:[#allocation35_spill] sm:$0xff]  ;;  %v1319_v15 = vsel %vm266_vm2, %v2197_v1, %v4939_v19  ;;  %v4949_v1 = vld [vmem:[#allocation92_spill] sm:$0xff] }
 0x278   : > { %v1133_v17 = vpop.permute.xlu2 %1132  ;;  %v1447_v21 = vsel %vm1417_vm6, %v1414_v0, %v4936_v25  ;;  %v1448_v22 = vsel %vm1417_vm6, %v1415_v13, %v3434_v14  ;;  %v4940_v14 = vld [vmem:[#allocation75_spill] sm:$0xff]  ;;  %v4943_v29 = vld [vmem:[#allocation146_spill] sm:$0xff]  ;;  %v4945_v0 = vld [vmem:[#allocation133_spill] sm:$0xff] }
 0x279   : > { %v1075_v48 = vpop.permute.xlu1 %1074  ;;  %v3934_v41 = vsel %vm1516_vm10, %v1489_v6, %v1133_v17  ;;  %v1073_v4 = vpop.permute.xlu0 %1072  ;;  %v4937_v17 = vld [vmem:[#allocation173_spill] sm:$0xff]  ;;  %v1352_v16 = vsel %vm1351_vm4, %v1319_v15, %v4940_v14  ;;  %v4944_v63 = vld [vmem:[#allocation67_spill] sm:$0xff]  ;;  %v4950_v15 = vld [vmem:[#allocation112_spill] sm:$0xff] }
 0x27a   : > { %v3939_v31 = vsel %vm1483_vm8, %v1478_v10, %v1075_v48  ;;  %v3942_v61 = vsel %vm1483_vm8, %v1477_v55, %v1073_v4  ;;  %v1481_v10 = vsel %vm1450_vm7, %v1448_v22, %v4937_v17  ;;  %v4938_v55 = vld [vmem:[#allocation177_spill] sm:$0xff]  ;;  %v1385_v44 = vsel %vm1384_vm5, %v1352_v16, %v4941_v23  ;;  %v4952_v16 = vld [vmem:[#allocation147_spill] sm:$0xff] }
 0x27b   : > { %v1480_v48 = vsel %vm1450_vm7, %v1447_v21, %v4938_v55  ;;  %v1418_v13 = vsel %vm1417_vm6, %v1385_v44, %v4943_v29  ;;  %v4951_v14 = vld [vmem:[#allocation49_spill] sm:$0xff]  ;;  %v4953_v44 = vld [vmem:[#allocation34_spill] sm:$0xff]  ;;  %v4955_v29 = vld [vmem:[#allocation167_spill] sm:$0xff] }
 0x27e   : > { %1164 = vrot.lane.b32.xlu2 %v4931_v59, %s2234_s30  ;;  %v4942_v59 = vld [vmem:[#allocation158_spill] sm:$0xff] }
 0x27f   : > { %1247 = vrot.lane.b32.xlu1 %v4934_v34, %s2235_s4  ;;  %1231 = vrot.lane.b32.xlu0 %v4935_v37, %s2235_s4  ;;  %v4946_v34 = vld [vmem:[#allocation160_spill] sm:$0xff] }
 0x280   : > { %v1256_v6 = vpop.permute.xlu2 %1255  ;;  %v1451_v37 = vsel %vm1450_vm7, %v1418_v13, %v4946_v34 }
 0x281   : > { %v1081_v4 = vpop.permute.xlu1 %1080  ;;  %v1079_v49 = vpop.permute.xlu0 %1078  ;;  %v1484_v21 = vsel %vm1483_vm8, %v1451_v37, %v3566_v58 }
 0x282   : > { %v3979_v62 = vsel %vm1483_vm8, %v1481_v10, %v1081_v4  ;;  %v3982_v57 = vsel %vm1483_vm8, %v1480_v48, %v1079_v49  ;;  %v4947_v48 = vld [vmem:[#allocation31_spill] sm:$0xff] }
 0x283   : > { %v4948_v4 = vld [vmem:[#allocation159_spill] sm:$0xff] }
 0x284   : > { %v1323_v49 = vsel %vm266_vm2, %v4948_v4, %v4947_v48  ;;  %270 = vst.msk [vmem:[%s2303_s23 + $0xf] sm:$0xfe] %vm264_vm13, %v4948_v4  ;;  %v5027_v4 = vld [vmem:[#allocation101_spill] sm:$0xff] }
 0x285   : > { %v1356_v19 = vsel %vm1351_vm4, %v1323_v49, %v4949_v1  ;;  %297 = vst.msk [vmem:[%s2303_s23 + $0x9f] sm:$0xfe] %vm264_vm13, %v5027_v4 }
 0x286   : > { %1281 = vrot.lane.b32.xlu2 %v4942_v59, %s2235_s4  ;;  %v1389_v58 = vsel %vm1384_vm5, %v1356_v19, %v4950_v15  ;;  %v4954_v59 = vld [vmem:[#allocation13_spill] sm:$0xff]  ;;  %v4043_v19 = vld [vmem:[%s2277_s19 + $0x120] sm:$0xff]  ;;  %v4959_v15 = vld [vmem:[#allocation80_spill] sm:$0xff] }
 0x287   : > { %1265 = vrot.lane.b32.xlu1 %v4944_v63, %s2235_s4  ;;  %1180 = vrot.lane.b32.xlu0 %v4945_v0, %s2234_s30  ;;  %v1422_v23 = vsel %vm1417_vm6, %v1389_v58, %v4952_v16  ;;  %v4956_v0 = vld [vmem:[#allocation175_spill] sm:$0xff]  ;;  %v1343_v58 = vsel %vm266_vm2, %v4043_v19, %v4959_v15  ;;  %v4070_v15 = vld [vmem:[%s2277_s19 + $0x60] sm:$0xff]  ;;  %300 = vst.msk [vmem:[%s2303_s23 + $0xaf] sm:$0xfe] %vm264_vm13, %v4043_v19 }
 0x288   : > { %v1224_v25 = vpop.permute.xlu2 %1223  ;;  %v1455_v13 = vsel %vm1450_vm7, %v1422_v23, %v4955_v29  ;;  %v4961_v23 = vld [vmem:[#allocation138_spill] sm:$0xff]  ;;  %276 = vst.msk [vmem:[%s2303_s23 + $0x2f] sm:$0xfe] %vm264_vm13, %v4070_v15 }
 0x289   : > { %v4003_v22 = vpop.permute.xlu1 %1124  ;;  %v1123_v17 = vpop.permute.xlu0 %1122  ;;  %v1488_v34 = vsel %vm1483_vm8, %v1455_v13, %v4956_v0  ;;  %v4963_v29 = vld [vmem:[#allocation18_spill] sm:$0xff]  ;;  %v4964_v13 = vld [vmem:[#allocation172_spill] sm:$0xff] }
 0x28a   : > { %v1517_v10 = vsel %vm1516_vm10, %v1484_v21, %v1123_v17  ;;  %v4957_v17 = vld [vmem:[#allocation66_spill] sm:$0xff] }
 0x28b   : > { %v1550_v55 = vsel %vm1549_vm11, %v1517_v10, %v1224_v25  ;;  %v4958_v10 = vld [vmem:[#allocation22_spill] sm:$0xff] }
 0x28c   : > { %2103 = vmatmul.msk.f32.vlgmr.msra.gmra.mxu0 %vm1591_vm12, %v1550_v55 }
 0x28e   : > { %1249 = vrot.lane.b32.xlu2 %v4951_v14, %s2235_s4 }
 0x28f   : > { %1233 = vrot.lane.b32.xlu1 %v4953_v44, %s2235_s4  ;;  %1148 = vrot.lane.b32.xlu0 %v4954_v59, %s2234_s30  ;;  %v4962_v59 = vld [vmem:[#allocation162_spill] sm:$0xff] }
 0x290   : > { %v1173_v63 = vpop.permute.xlu2 %1172 }
 0x291   : > { %v1131_v37 = vpop.permute.xlu1 %1130  ;;  %v4027_v25 = vpop.permute.xlu0 %1128 }
 0x292   : > { %v4030_v21 = vsel %vm1516_vm10, %v1488_v34, %v1131_v37 }
 0x296   : > { %1267 = vrot.lane.b32.xlu2 %v4957_v17, %s2235_s4 }
 0x297   : > { %1182 = vrot.lane.b32.xlu1 %v3887_v38, %s2234_s30  ;;  %1166 = vrot.lane.b32.xlu0 %v4958_v10, %s2234_s30  ;;  %v4960_v38 = vld [vmem:[#allocation99_spill] sm:$0xff] }
 0x298   : > { %v4038_v55 = vpop.permute.xlu2 %1140  ;;  %v1376_v16 = vsel %vm1351_vm4, %v1343_v58, %v4960_v38  ;;  %v4966_v58 = vld [vmem:[#allocation37_spill] sm:$0xff] }
 0x299   : > { %v1171_v48 = vpop.permute.xlu1 %1170  ;;  %v1155_v49 = vpop.permute.xlu0 %1154  ;;  %v1409_v44 = vsel %vm1384_vm5, %v1376_v16, %v4961_v23  ;;  %v263_v23 = vld [vmem:[%s2277_s19 + $0x1a8] sm:$0x3] }
 0x29a   : > { %v1533_v1 = vsel %vm1516_vm10, %v3615_v60, %v1155_v49  ;;  %v1442_v60 = vsel %vm1417_vm6, %v1409_v44, %v4962_v59  ;;  %v4970_v59 = vld [vmem:[#allocation27_spill] sm:$0xff] }
 0x29b   : > { %v1566_v14 = vsel %vm1549_vm11, %v1533_v1, %v1256_v6  ;;  %v1475_v0 = vsel %vm1450_vm7, %v1442_v60, %v4964_v13  ;;  %v4965_v6 = vld [vmem:[#allocation8_spill] sm:$0xff] }
 0x29c   : > { %2119 = vmatmul.msk.f32.vlgmr.msra.gmra.mxu2 %vm1591_vm12, %v1566_v14  ;;  %v1508_v34 = vsel %vm1483_vm8, %v1475_v0, %v3876_v56  ;;  %v1327_v14 = vsel %vm266_vm2, %v4070_v15, %v4966_v58  ;;  %v4968_v56 = vld [vmem:[#allocation126_spill] sm:$0xff]  ;;  %v4971_v60 = vld [vmem:[#allocation168_spill] sm:$0xff]  ;;  %v5028_v15 = vld [vmem:[#allocation105_spill] sm:$0xff] }
 0x29d   : > { %v1541_v17 = vsel %vm1516_vm10, %v1508_v34, %v1171_v48  ;;  %v4969_v48 = vld [vmem:[#allocation142_spill] sm:$0xff]  ;;  %v4972_v13 = vld [vmem:[#allocation48_spill] sm:$0xff]  ;;  %312 = vst.msk [vmem:[%s2303_s23 + $0xef] sm:$0xfe] %vm264_vm13, %v5028_v15 }
 0x29e   : > { %1150 = vrot.lane.b32.xlu2 %v4963_v29, %s2234_s30  ;;  %v4973_v0 = vld [vmem:[#allocation40_spill] sm:$0xff] }
 0x29f   : > { %1134 = vrot.lane.b32.xlu1 %v4965_v6, %s2234_s30  ;;  %1283 = vrot.lane.b32.xlu0 %v1220_v50, %s2235_s4  ;;  %v4967_v50 = vld [vmem:[#allocation94_spill] sm:$0xff]  ;;  %v1221_v6 = vrot.slane %v263_v23, 2 }
 0x2a0   : > { %v4065_v37 = vpop.permute.xlu2 %1158  ;;  %v1360_v38 = vsel %vm1351_vm4, %v1327_v14, %v4967_v50 }
 0x2a1   : > { %v1139_v10 = vpop.permute.xlu1 %1138  ;;  %v1272_v49 = vpop.permute.xlu0 %1271  ;;  %v1393_v16 = vsel %vm1384_vm5, %v1360_v38, %v4968_v56  ;;  %v1222_v38 = vsel %vm540_vm3, %v1219_v9, %v1221_v6 }
 0x2a2   : > { %v1574_v1 = vsel %vm1549_vm11, %v1541_v17, %v1272_v49  ;;  %v1426_v44 = vsel %vm1417_vm6, %v1393_v16, %v4969_v48  ;;  %v1120_v49 = vrot.slane %v263_v23, 1 }
 0x2a3   : > { %2127 = vmatmul.msk.f32.vlgmr.msra.gmra.mxu3 %vm1591_vm12, %v1574_v1  ;;  %v1459_v29 = vsel %vm1450_vm7, %v1426_v44, %v4971_v60  ;;  %v2200_v44 = vld [vmem:[%s2277_s19 + $0x8] sm:$0xff] }
 0x2a4   : > { %v1492_v34 = vsel %vm1483_vm8, %v1459_v29, %v3641_v7  ;;  %v1121_v56 = vsel %vm363_vm0, %v1118_v20, %v1120_v49  ;;  %v4974_v7 = vld [vmem:[#allocation65_spill] sm:$0xff]  ;;  %v4976_v29 = vld [vmem:[#allocation58_spill] sm:$0xff] }
 0x2a5   : > { %v1525_v1 = vsel %vm1516_vm10, %v1492_v34, %v1139_v10  ;;  %v1542_v10 = vsel %vm1516_vm10, %v3713_v28, %v1173_v63  ;;  %v4978_v28 = vld [vmem:[#allocation84_spill] sm:$0xff]  ;;  %v4979_v63 = vld [vmem:[#allocation89_spill] sm:$0xff] }
 0x2a6   : > { %1168 = vrot.lane.b32.xlu2 %v4970_v59, %s2234_s30  ;;  %v4975_v59 = vld [vmem:[#allocation47_spill] sm:$0xff]  ;;  %v4980_v34 = vld [vmem:[#allocation109_spill] sm:$0xff] }
 0x2a7   : > { %1251 = vrot.lane.b32.xlu1 %v4972_v13, %s2235_s4  ;;  %1235 = vrot.lane.b32.xlu0 %v4973_v0, %s2235_s4  ;;  %v1320_v60 = vsel %vm266_vm2, %v2200_v44, %v4975_v59  ;;  %v4977_v13 = vld [vmem:[#allocation3_spill] sm:$0xff]  ;;  %v4989_v44 = vld [vmem:[#allocation174_spill] sm:$0xff] }
 0x2a8   : > { %v1276_v17 = vpop.permute.xlu2 %1275  ;;  %v1328_v0 = vsel %vm266_vm2, %v4977_v13, %v4976_v29  ;;  %v1353_v6 = vsel %vm1351_vm4, %v1320_v60, %v4979_v63 }
 0x2a9   : > { %v1157_v58 = vpop.permute.xlu1 %1156  ;;  %v1240_v14 = vpop.permute.xlu0 %1239  ;;  %v1386_v49 = vsel %vm1384_vm5, %v1353_v6, %v4980_v34 }
 0x2aa   : > { %v1558_v50 = vsel %vm1549_vm11, %v1525_v1, %v1240_v14  ;;  %v1534_v16 = vsel %vm1516_vm10, %v3773_v12, %v1157_v58  ;;  %v1361_v12 = vsel %vm1351_vm4, %v1328_v0, %v4978_v28  ;;  %v4981_v1 = vld [vmem:[#allocation125_spill] sm:$0xff] }
 0x2ab   : > { %2111 = vmatmul.msk.f32.vlgmr.msra.gmra.mxu1 %vm1591_vm12, %v1558_v50  ;;  %v1394_v58 = vsel %vm1384_vm5, %v1361_v12, %v4981_v1  ;;  %v4982_v14 = vld [vmem:[#allocation145_spill] sm:$0xff] }
 0x2ac   : > { %v1419_v50 = vsel %vm1417_vm6, %v1386_v49, %v4982_v14  ;;  %v4165_v14 = vld [vmem:[%s2277_s19 + $0x78] sm:$0xff] }
 0x2ad   : > { %279 = vst.msk [vmem:[%s2303_s23 + $0x3f] sm:$0xfe] %vm264_vm13, %v4165_v14 }
 0x2ae   : > { %1285 = vrot.lane.b32.xlu2 %v1222_v38, %s2235_s4  ;;  %v4983_v38 = vld [vmem:[#allocation152_spill] sm:$0xff] }
 0x2af   : > { %1269 = vrot.lane.b32.xlu1 %v4974_v7, %s2235_s4  ;;  %1184 = vrot.lane.b32.xlu0 %v1121_v56, %s2234_s30  ;;  %v1427_v56 = vsel %vm1417_vm6, %v1394_v58, %v4983_v38  ;;  %v4984_v7 = vld [vmem:[#allocation39_spill] sm:$0xff] }
 0x2b0   : > { %v1244_v9 = vpop.permute.xlu2 %1243 }
 0x2b1   : > { %v1274_v23 = vpop.permute.xlu1 %1273  ;;  %v1258_v48 = vpop.permute.xlu0 %1257 }
 0x2b2   : > { %v1567_v54 = vsel %vm1549_vm11, %v1534_v16, %v1258_v48  ;;  %v1575_v20 = vsel %vm1549_vm11, %v1542_v10, %v1274_v23  ;;  %v4985_v10 = vld [vmem:[#allocation164_spill] sm:$0xff]  ;;  %v4986_v23 = vld [vmem:[#allocation166_spill] sm:$0xff] }
 0x2b3   : > { %2120 = vmatmul.msk.f32.gmra.mxu2 %vm1591_vm12, %v1567_v54  ;;  %2128 = vmatmul.msk.f32.gmra.mxu3 %vm1591_vm12, %v1575_v20  ;;  %v1460_v16 = vsel %vm1450_vm7, %v1427_v56, %v4985_v10  ;;  %v1452_v48 = vsel %vm1450_vm7, %v1419_v50, %v4986_v23  ;;  %v4987_v54 = vld [vmem:[#allocation17_spill] sm:$0xff]  ;;  %v4988_v20 = vld [vmem:[#allocation7_spill] sm:$0xff]  ;;  %v4993_v56 = vld [vmem:[#allocation116_spill] sm:$0xff] }
 0x2b4   : > { %v1485_v59 = vsel %vm1483_vm8, %v1452_v48, %v4989_v44  ;;  %v1493_v60 = vsel %vm1483_vm8, %v1460_v16, %v3636_v52  ;;  %v4990_v52 = vld [vmem:[#allocation55_spill] sm:$0xff]  ;;  %v4991_v50 = vld [vmem:[#allocation57_spill] sm:$0xff]  ;;  %v4994_v10 = vld [vmem:[#allocation54_spill] sm:$0xff] }
 0x2b5   : > { %v1518_v29 = vsel %vm1516_vm10, %v1485_v59, %v4003_v22  ;;  %v1526_v13 = vsel %vm1516_vm10, %v1493_v60, %v4038_v55  ;;  %v1535_v22 = vsel %vm1516_vm10, %v3770_v11, %v4065_v37  ;;  %v1329_v38 = vsel %vm266_vm2, %v4165_v14, %v4991_v50  ;;  %v4992_v11 = vld [vmem:[#allocation98_spill] sm:$0xff]  ;;  %v4995_v23 = vld [vmem:[#allocation171_spill] sm:$0xff]  ;;  %v4996_v48 = vld [vmem:[#allocation12_spill] sm:$0xff] }
 0x2b6   : > { %1237 = vrot.lane.b32.xlu2 %v4984_v7, %s2235_s4  ;;  %v1362_v37 = vsel %vm1351_vm4, %v1329_v38, %v4992_v11 }
 0x2b7   : > { %1152 = vrot.lane.b32.xlu1 %v4987_v54, %s2234_s30  ;;  %1136 = vrot.lane.b32.xlu0 %v4988_v20, %s2234_s30 }
 0x2b8   : > { %v1262_v6 = vpop.permute.xlu2 %1261 }
 0x2b9   : > { %v1242_v0 = vpop.permute.xlu1 %1241  ;;  %v1226_v28 = vpop.permute.xlu0 %1225 }
 0x2ba   : > { %v1551_v12 = vsel %vm1549_vm11, %v1518_v29, %v1226_v28  ;;  %v1559_v63 = vsel %vm1549_vm11, %v1526_v13, %v1242_v0  ;;  %v4997_v29 = vld [vmem:[#allocation46_spill] sm:$0xff] }
 0x2bb   : > { %2104 = vmatmul.msk.f32.gmra.mxu0 %vm1591_vm12, %v1551_v12  ;;  %2112 = vmatmul.msk.f32.gmra.mxu1 %vm1591_vm12, %v1559_v63  ;;  %v4998_v13 = vld [vmem:[#allocation2_spill] sm:$0xff] }
 0x2bc   : > { %v1322_v0 = vsel %vm266_vm2, %v4998_v13, %v4997_v29  ;;  %v4999_v12 = vld [vmem:[#allocation78_spill] sm:$0xff] }
 0x2bd   : > { %v1355_v63 = vsel %vm1351_vm4, %v1322_v0, %v4999_v12 }
 0x2bf   : > { %1253 = vrot.lane.b32.xlu0 %v4990_v52, %s2235_s4  ;;  %v5000_v52 = vld [vmem:[#allocation120_spill] sm:$0xff] }
 0x2c0   : > { %v1230_v7 = vpop.permute.xlu2 %1229 }
 0x2c1   : > { %v1260_v55 = vpop.permute.xlu1 %1259  ;;  %v1175_v34 = vpop.permute.xlu0 %1174 }
 0x2c2   : > { %v1543_v49 = vsel %vm1516_vm10, %v3942_v61, %v1175_v34  ;;  %v1568_v1 = vsel %vm1549_vm11, %v1535_v22, %v1260_v55  ;;  %v1395_v61 = vsel %vm1384_vm5, %v1362_v37, %v4993_v56  ;;  %v1388_v22 = vsel %vm1384_vm5, %v1355_v63, %v5000_v52  ;;  %v5001_v55 = vld [vmem:[#allocation148_spill] sm:$0xff] }
 0x2c3   : > { %2121 = vmatmul.msk.f32.gmra.mxu2 %vm1591_vm12, %v1568_v1  ;;  %v1576_v58 = vsel %vm1549_vm11, %v1543_v49, %v1276_v17  ;;  %v1428_v16 = vsel %vm1417_vm6, %v1395_v61, %v4994_v10  ;;  %v1421_v34 = vsel %vm1417_vm6, %v1388_v22, %v5001_v55 }
 0x2c4   : > { %2129 = vmatmul.msk.f32.gmra.mxu3 %vm1591_vm12, %v1576_v58  ;;  %v1461_v17 = vsel %vm1450_vm7, %v1428_v16, %v4995_v23  ;;  %v5003_v23 = vld [vmem:[#allocation41_spill] sm:$0xff] }
 0x2c5   : > { %v1494_v54 = vsel %vm1483_vm8, %v1461_v17, %v4996_v48  ;;  %v5004_v17 = vld [vmem:[#allocation6_spill] sm:$0xff] }
 0x2c8   : > { %v1179_v58 = vpop.permute.xlu2 %1178 }
 0x2c9   : > { %v1228_v20 = vpop.permute.xlu1 %1227  ;;  %v1143_v44 = vpop.permute.xlu0 %1142  ;;  %v1545_v63 = vsel %vm1516_vm10, %v3767_v8, %v1179_v58  ;;  %v5010_v8 = vld [vmem:[#allocation87_spill] sm:$0xff] }
 0x2ca   : > { %v1527_v59 = vsel %vm1516_vm10, %v1494_v54, %v1143_v44  ;;  %v1552_v60 = vsel %vm1549_vm11, %v3879_v27, %v1228_v20  ;;  %v5002_v27 = vld [vmem:[#allocation161_spill] sm:$0xff]  ;;  %v5007_v20 = vld [vmem:[#allocation38_spill] sm:$0xff] }
 0x2cb   : > { %2105 = vmatmul.msk.f32.gmra.mxu0 %vm1591_vm12, %v1552_v60  ;;  %v1560_v28 = vsel %vm1549_vm11, %v1527_v59, %v1244_v9  ;;  %v1454_v49 = vsel %vm1450_vm7, %v1421_v34, %v5002_v27  ;;  %v5008_v44 = vld [vmem:[#allocation170_spill] sm:$0xff]  ;;  %v4235_v27 = vld [vmem:[%s2277_s19 + $0x90] sm:$0xff] }
 0x2cc   : > { %2113 = vmatmul.msk.f32.gmra.mxu1 %vm1591_vm12, %v1560_v28  ;;  %v1487_v1 = vsel %vm1483_vm8, %v1454_v49, %v3586_v18  ;;  %v5009_v49 = vld [vmem:[#allocation64_spill] sm:$0xff]  ;;  %282 = vst.msk [vmem:[%s2303_s23 + $0x4f] sm:$0xfe] %vm264_vm13, %v4235_v27 }
 0x2cd   : > { %v1520_v9 = vsel %vm1516_vm10, %v1487_v1, %v4027_v25  ;;  %v1331_v1 = vsel %vm266_vm2, %v4235_v27, %v5009_v49 }
 0x2ce   : > { %v1553_v37 = vsel %vm1549_vm11, %v1520_v9, %v1230_v7  ;;  %v5005_v7 = vld [vmem:[#allocation97_spill] sm:$0xff]  ;;  %v1364_v58 = vsel %vm1351_vm4, %v1331_v1, %v5010_v8  ;;  %v5016_v8 = vld [vmem:[#allocation123_spill] sm:$0xff] }
 0x2d0   : > { %v1147_v16 = vpop.permute.xlu2 %1146 }
 0x2d1   : > { %v1177_v50 = vpop.permute.xlu1 %1176  ;;  %v1161_v38 = vpop.permute.xlu0 %1160 }
 0x2d2   : > { %v1536_v11 = vsel %vm1516_vm10, %v3639_v51, %v1161_v38  ;;  %v1544_v18 = vsel %vm1516_vm10, %v3939_v31, %v1177_v50  ;;  %v1330_v51 = vsel %vm266_vm2, %v5004_v17, %v5003_v23  ;;  %v5012_v50 = vld [vmem:[#allocation154_spill] sm:$0xff] }
 0x2d3   : > { %2106 = vmatmul.msk.f32.gmra.mxu0 %vm1591_vm12, %v1553_v37  ;;  %v1569_v56 = vsel %vm1549_vm11, %v1536_v11, %v1262_v6  ;;  %v1363_v48 = vsel %vm1351_vm4, %v1330_v51, %v5005_v7  ;;  %v5006_v6 = vld [vmem:[#allocation128_spill] sm:$0xff]  ;;  %v5013_v37 = vld [vmem:[#allocation165_spill] sm:$0xff] }
 0x2d4   : > { %2122 = vmatmul.msk.f32.gmra.mxu2 %vm1591_vm12, %v1569_v56  ;;  %v1396_v54 = vsel %vm1384_vm5, %v1363_v48, %v5006_v6 }
 0x2d5   : > { %v1429_v31 = vsel %vm1417_vm6, %v1396_v54, %v5007_v20 }
 0x2d6   : > { %v1462_v59 = vsel %vm1450_vm7, %v1429_v31, %v5008_v44 }
 0x2d7   : > { %v1495_v60 = vsel %vm1483_vm8, %v1462_v59, %v3668_v42  ;;  %v4276_v59 = vld [vmem:[%s4532_s2] ss:$0 sm:$0xff] }
 0x2d8   : > { %v1165_v12 = vpop.permute.xlu2 %1164 }
 0x2d9   : > { %v1145_v61 = vpop.permute.xlu1 %1144  ;;  %v1278_v10 = vpop.permute.xlu0 %1277  ;;  %v1538_v7 = vsel %vm1516_vm10, %v3833_v47, %v1165_v12 }
 0x2da   : > { %v1577_v25 = vsel %vm1549_vm11, %v1544_v18, %v1278_v10  ;;  %v1528_v29 = vsel %vm1516_vm10, %v1495_v60, %v1145_v61 }
 0x2db   : > { %2130 = vmatmul.msk.f32.gmra.mxu3 %vm1591_vm12, %v1577_v25 }
 0x2e0   : > { %v1282_v11 = vpop.permute.xlu2 %1281 }
 0x2e1   : > { %v1163_v13 = vpop.permute.xlu1 %1162  ;;  %v1246_v0 = vpop.permute.xlu0 %1245 }
 0x2e2   : > { %v1561_v28 = vsel %vm1549_vm11, %v1528_v29, %v1246_v0  ;;  %v1537_v52 = vsel %vm1516_vm10, %v3836_v40, %v1163_v13  ;;  %v5011_v40 = vld [vmem:[#allocation127_spill] sm:$0xff] }
 0x2e3   : > { %2114 = vmatmul.msk.f32.gmra.mxu1 %vm1591_vm12, %v1561_v28  ;;  %v1397_v9 = vsel %vm1384_vm5, %v1364_v58, %v5011_v40  ;;  %v5017_v40 = vld [vmem:[#allocation151_spill] sm:$0xff] }
 0x2e4   : > { %v1430_v38 = vsel %vm1417_vm6, %v1397_v9, %v5012_v50 }
 0x2e5   : > { %v1463_v56 = vsel %vm1450_vm7, %v1430_v38, %v5013_v37 }
 0x2e6   : > { %v1496_v18 = vsel %vm1483_vm8, %v1463_v56, %v3663_v45 }
 0x2e7   : > { %v1529_v61 = vsel %vm1516_vm10, %v1496_v18, %v1147_v16 }
 0x2e8   : > { %v1250_v51 = vpop.permute.xlu2 %1249 }
 0x2e9   : > { %v1280_v22 = vpop.permute.xlu1 %1279  ;;  %v1264_v55 = vpop.permute.xlu0 %1263 }
 0x2ea   : > { %v1570_v34 = vsel %vm1549_vm11, %v1537_v52, %v1264_v55  ;;  %v1578_v42 = vsel %vm1549_vm11, %v1545_v63, %v1280_v22 }
 0x2eb   : > { %2123 = vmatmul.msk.f32.gmra.mxu2 %vm1591_vm12, %v1570_v34  ;;  %2131 = vmatmul.msk.f32.gmra.mxu3 %vm1591_vm12, %v1578_v42  ;;  %v2203_v34 = vld [vmem:[%s2277_s19 + $0x48] sm:$0xff]  ;;  %v5014_v42 = vld [vmem:[#allocation53_spill] sm:$0xff] }
 0x2ec   : > { %v1325_v49 = vsel %vm266_vm2, %v2203_v34, %v5014_v42  ;;  %273 = vst.msk [vmem:[%s2303_s23 + $0x1f] sm:$0xfe] %vm264_vm13, %v2203_v34 }
 0x2f0   : > { %v1268_v44 = vpop.permute.xlu2 %1267 }
 0x2f1   : > { %v1248_v10 = vpop.permute.xlu1 %1247  ;;  %v1232_v25 = vpop.permute.xlu0 %1231 }
 0x2f2   : > { %v1554_v23 = vsel %vm1549_vm11, %v4030_v21, %v1232_v25  ;;  %v1562_v17 = vsel %vm1549_vm11, %v1529_v61, %v1248_v10 }
 0x2f3   : > { %2107 = vmatmul.msk.f32.gmra.mxu0 %vm1591_vm12, %v1554_v23  ;;  %2115 = vmatmul.msk.f32.gmra.mxu1 %vm1591_vm12, %v1562_v17 }
 0x2f8   : > { %v1151_v12 = vpop.permute.xlu2 %1150 }
 0x2f9   : > { %v1266_v48 = vpop.permute.xlu1 %1265  ;;  %v1181_v6 = vpop.permute.xlu0 %1180  ;;  %v1531_v37 = vsel %vm1516_vm10, %v3719_v26, %v1151_v12 }
 0x2fa   : > { %v1546_v45 = vsel %vm1516_vm10, %v3982_v57, %v1181_v6  ;;  %v1571_v16 = vsel %vm1549_vm11, %v1538_v7, %v1266_v48  ;;  %v5019_v6 = vld [vmem:[#allocation52_spill] sm:$0xff] }
 0x2fb   : > { %2124 = vmatmul.msk.f32.gmra.mxu2 %vm1591_vm12, %v1571_v16  ;;  %v1579_v21 = vsel %vm1549_vm11, %v1546_v45, %v1282_v11  ;;  %v5020_v45 = vld [vmem:[#allocation4_spill] sm:$0xff] }
 0x2fc   : > { %2132 = vmatmul.msk.f32.gmra.mxu3 %vm1591_vm12, %v1579_v21  ;;  %v1326_v16 = vsel %vm266_vm2, %v5020_v45, %v5019_v6  ;;  %v5021_v21 = vld [vmem:[#allocation95_spill] sm:$0xff] }
 0x300   : > { %v1169_v50 = vpop.permute.xlu2 %1168 }
 0x301   : > { %v1234_v54 = vpop.permute.xlu1 %1233  ;;  %v1149_v20 = vpop.permute.xlu0 %1148  ;;  %v1540_v17 = vsel %vm1516_vm10, %v3882_v36, %v1169_v50  ;;  %v1359_v36 = vsel %vm1351_vm4, %v1326_v16, %v5021_v21 }
 0x302   : > { %v1530_v31 = vsel %vm1516_vm10, %v3589_v2, %v1149_v20  ;;  %v1555_v47 = vsel %vm1549_vm11, %v3934_v41, %v1234_v54  ;;  %v5022_v54 = vld [vmem:[#allocation9_spill] sm:$0xff] }
 0x303   : > { %2108 = vmatmul.msk.f32.gmra.mxu0 %vm1591_vm12, %v1555_v47  ;;  %v1563_v57 = vsel %vm1549_vm11, %v1530_v31, %v1250_v51  ;;  %v1392_v20 = vsel %vm1384_vm5, %v1359_v36, %v5022_v54  ;;  %v5023_v31 = vld [vmem:[#allocation150_spill] sm:$0xff] }
 0x304   : > { %2116 = vmatmul.msk.f32.gmra.mxu1 %vm1591_vm12, %v1563_v57  ;;  %v1425_v47 = vsel %vm1417_vm6, %v1392_v20, %v5023_v31 }
 0x308   : > { %v1286_v23 = vpop.permute.xlu2 %1285 }
 0x309   : > { %v1183_v60 = vpop.permute.xlu1 %1182  ;;  %v1709_v29 = vpop.f32.mrf.mxu0 }
 0x30a   : > { %v1710_v2 = vadd.f32 %v4276_v59, %v1709_v29  ;;  %v1167_v13 = vpop.permute.xlu0 %1166  ;;  %v1547_v52 = vsel %vm1516_vm10, %v3979_v62, %v1183_v60  ;;  %v5018_v62 = vld [vmem:[#allocation163_spill] sm:$0xff]  ;;  %v5025_v60 = vld [vmem:[#allocation176_spill] sm:$0xff] }
 0x30b   : > { %v1539_v41 = vsel %vm1516_vm10, %v3666_v33, %v1167_v13  ;;  %v5015_v33 = vld [vmem:[#allocation81_spill] sm:$0xff] }
 0x30c   : > { %v1805_v0 = vmax.f32 %v1710_v2, 0.0  ;;  %v1572_v28 = vsel %vm1549_vm11, %v1539_v41, %v1268_v44  ;;  %v1358_v1 = vsel %vm1351_vm4, %v1325_v49, %v5015_v33 }
 0x30d   : > { %2125 = vmatmul.msk.f32.gmra.mxu2 %vm1591_vm12, %v1572_v28  ;;  %v1391_v58 = vsel %vm1384_vm5, %v1358_v1, %v5016_v8 }
 0x30e   : > { %1869 = vrot.lane.b32.xlu1 %v1805_v0, %s2228_s24  ;;  %v1424_v9 = vsel %vm1417_vm6, %v1391_v58, %v5017_v40 }
 0x30f   : > { %v1457_v38 = vsel %vm1450_vm7, %v1424_v9, %v5018_v62 }
 0x310   : > { %v1490_v11 = vsel %vm1483_vm8, %v1457_v38, %v3612_v3  ;;  %v1238_v57 = vpop.permute.xlu2 %1237 }
 0x311   : > { %v1135_v63 = vpop.permute.xlu1 %1134 }
 0x312   : > { %v1284_v22 = vpop.permute.xlu0 %1283  ;;  %v1523_v18 = vsel %vm1516_vm10, %v1490_v11, %v1135_v63 }
 0x313   : > { %v1580_v55 = vsel %vm1549_vm11, %v1547_v52, %v1284_v22 }
 0x314   : > { %2133 = vmatmul.msk.f32.gmra.mxu3 %vm1591_vm12, %v1580_v55 }
 0x319   : > { %v1252_v56 = vpop.permute.xlu1 %1251 }
 0x31a   : > { %v1236_v61 = vpop.permute.xlu0 %1235  ;;  %v1564_v10 = vsel %vm1549_vm11, %v1531_v37, %v1252_v56 }
 0x31b   : > { %v1556_v25 = vsel %vm1549_vm11, %v1523_v18, %v1236_v61  ;;  %2117 = vmatmul.msk.f32.gmra.mxu1 %vm1591_vm12, %v1564_v10 }
 0x31c   : > { %2109 = vmatmul.msk.f32.gmra.mxu0 %vm1591_vm12, %v1556_v25 }
 0x31f   : > { %v4390_v27 = vpop.f32.mrf.mxu2 }
 0x320   : > { %v1758_v15 = vadd.f32 %v4276_v59, %v4390_v27 }
 0x321   : > { %v1270_v3 = vpop.permute.xlu1 %1269 }
 0x322   : > { %v1185_v51 = vpop.permute.xlu0 %1184  ;;  %v1573_v26 = vsel %vm1549_vm11, %v1540_v17, %v1270_v3 }
 0x323   : > { %v1548_v7 = vsel %vm1516_vm10, %v3830_v43, %v1185_v51  ;;  %2126 = vmatmul.msk.f32.gmra.mxu2 %vm1591_vm12, %v1573_v26  ;;  %v5024_v43 = vld [vmem:[#allocation169_spill] sm:$0xff] }
 0x324   : > { %v1581_v48 = vsel %vm1549_vm11, %v1548_v7, %v1286_v23  ;;  %v1458_v44 = vsel %vm1450_vm7, %v1425_v47, %v5024_v43 }
 0x325   : > { %2134 = vmatmul.msk.f32.gmra.mxu3 %vm1591_vm12, %v1581_v48  ;;  %v1491_v29 = vsel %vm1483_vm8, %v1458_v44, %v5025_v60 }
 0x326   : > { %v4402_v10 = vpop.f32.mrf.mxu3 }
 0x328   : > { %v1733_v58 = vpop.f32.mrf.mxu1 }
 0x329   : > { %v1153_v0 = vpop.permute.xlu1 %1152  ;;  %v1734_v62 = vadd.f32 %v4276_v59, %v1733_v58 }
 0x32a   : > { %v1137_v2 = vpop.permute.xlu0 %1136  ;;  %v1532_v28 = vsel %vm1516_vm10, %v3716_v53, %v1153_v0 }
 0x32b   : > { %v1524_v13 = vsel %vm1516_vm10, %v1491_v29, %v1137_v2  ;;  %v1813_v11 = vmax.f32 %v1734_v62, 0.0 }
 0x32c   : > { %v1557_v41 = vsel %vm1549_vm11, %v1524_v13, %v1238_v57 }
 0x32d   : > { %2110 = vmatmul.msk.f32.gmra.mxu0 %vm1591_vm12, %v1557_v41 }
 0x332   : > { %v1254_v12 = vpop.permute.xlu0 %1253 }
 0x333   : > { %v1565_v63 = vsel %vm1549_vm11, %v1532_v28, %v1254_v12 }
 0x334   : > { %2118 = vmatmul.msk.f32.gmra.mxu1 %vm1591_vm12, %v1565_v63 }
 0x336   : > { %v1760_v19 = vpop.f32.mrf.mxu2  ;;  %v4409_v48 = vpop.f32.mrf.mxu3 }
 0x337   : > { %v1761_v16 = vadd.f32 %v4276_v59, %v1760_v19 }
 0x338   : > { %v1712_v52 = vpop.f32.mrf.mxu0  ;;  %v1736_v35 = vpop.f32.mrf.mxu1 }
 0x339   : > { %v1713_v22 = vadd.f32 %v4276_v59, %v1712_v52  ;;  %v1737_v21 = vadd.f32 %v4276_v59, %v1736_v35  ;;  %v1822_v36 = vmax.f32 %v1761_v16, 0.0 }
 0x33b   : > { %v1806_v55 = vmax.f32 %v1713_v22, 0.0  ;;  %v1814_v54 = vmax.f32 %v1737_v21, 0.0 }
 0x33d   : > { %1871 = vrot.lane.b32.xlu2 %v1806_v55, %s2228_s24 }
 0x346   : > { %v1763_v50 = vpop.f32.mrf.mxu2 }
 0x347   : > { %v1787_v20 = vpop.f32.mrf.mxu3 }
 0x348   : > { %v1715_v42 = vpop.f32.mrf.mxu0 }
 0x349   : > { %v1716_v53 = vadd.f32 %v4276_v59, %v1715_v42  ;;  %v1739_v30 = vpop.f32.mrf.mxu1 }
 0x34a   : > { %v1740_v28 = vadd.f32 %v4276_v59, %v1739_v30  ;;  %v1821_v30 = vmax.f32 %v1758_v15, 0.0 }
 0x34b   : > { %v1807_v49 = vmax.f32 %v1716_v53, 0.0  ;;  %v1788_v53 = vadd.f32 %v4276_v59, %v1787_v20 }
 0x34c   : > { %v1815_v42 = vmax.f32 %v1740_v28, 0.0 }
 0x34d   : > { %1873 = vrot.lane.b32.xlu0 %v1807_v49, %s2228_s24  ;;  %v1764_v49 = vadd.f32 %v4276_v59, %v1763_v50 }
 0x350   : > { %v1718_v33 = vpop.f32.mrf.mxu0 }
 0x351   : > { %v1719_v1 = vadd.f32 %v4276_v59, %v1718_v33 }
 0x353   : > { %v1808_v8 = vmax.f32 %v1719_v1, 0.0  ;;  %v1831_v1 = vmax.f32 %v1788_v53, 0.0 }
 0x355   : > { %1875 = vrot.lane.b32.xlu1 %v1808_v8, %s2228_s24  ;;  %v1823_v8 = vmax.f32 %v1764_v49, 0.0 }
 0x357   : > { %v4398_v37 = vpop.f32.mrf.mxu2 }
 0x35e   : > { %v1790_v29 = vpop.f32.mrf.mxu3 }
 0x360   : > { %v1742_v34 = vpop.f32.mrf.mxu1 }
 0x361   : > { %v1743_v56 = vadd.f32 %v4276_v59, %v1742_v34  ;;  %v1782_v34 = vadd.f32 %v4276_v59, %v4402_v10 }
 0x363   : > { %v1816_v61 = vmax.f32 %v1743_v56, 0.0  ;;  %v1829_v27 = vmax.f32 %v1782_v34, 0.0  ;;  %v1785_v56 = vadd.f32 %v4276_v59, %v4409_v48 }
 0x36e   : > { %v1769_v25 = vpop.f32.mrf.mxu2  ;;  %v1793_v22 = vpop.f32.mrf.mxu3 }
 0x36f   : > { %v1770_v47 = vadd.f32 %v4276_v59, %v1769_v25  ;;  %v1794_v10 = vadd.f32 %v4276_v59, %v1793_v22 }
 0x370   : > { %v1721_v32 = vpop.f32.mrf.mxu0  ;;  %v1745_v38 = vpop.f32.mrf.mxu1 }
 0x371   : > { %v1722_v5 = vadd.f32 %v4276_v59, %v1721_v32  ;;  %v1746_v43 = vadd.f32 %v4276_v59, %v1745_v38  ;;  %v1825_v57 = vmax.f32 %v1770_v47, 0.0  ;;  %v1833_v25 = vmax.f32 %v1794_v10, 0.0 }
 0x373   : > { %v1809_v14 = vmax.f32 %v1722_v5, 0.0  ;;  %v1817_v2 = vmax.f32 %v1746_v43, 0.0 }
 0x375   : > { %1877 = vrot.lane.b32.xlu2 %v1809_v14, %s2228_s24 }
 0x37e   : > { %v1772_v6 = vpop.f32.mrf.mxu2 }
 0x37f   : > { %v1796_v58 = vpop.f32.mrf.mxu3  ;;  %v1773_v32 = vadd.f32 %v4276_v59, %v1772_v6 }
 0x380   : > { %v1870_v46 = vpop.permute.xlu1 %1869  ;;  %v1724_v40 = vpop.f32.mrf.mxu0  ;;  %v1797_v4 = vadd.f32 %v4276_v59, %v1796_v58 }
 0x381   : > { %1966 = vst.msk [vmem:[%s2303_s23] sm:$0xff] %vm1965_vm14, %v1870_v46  ;;  %v1725_v24 = vadd.f32 %v4276_v59, %v1724_v40  ;;  %v1748_v18 = vpop.f32.mrf.mxu1  ;;  %v1826_v14 = vmax.f32 %v1773_v32, 0.0  ;;  %v1767_v46 = vadd.f32 %v4276_v59, %v4398_v37 }
 0x382   : > { %v1749_v33 = vadd.f32 %v4276_v59, %v1748_v18  ;;  %v1834_v5 = vmax.f32 %v1797_v4, 0.0 }
 0x383   : > { %v1810_v9 = vmax.f32 %v1725_v24, 0.0  ;;  %v1824_v40 = vmax.f32 %v1767_v46, 0.0 }
 0x384   : > { %v1818_v39 = vmax.f32 %v1749_v33, 0.0 }
 0x385   : > { %1879 = vrot.lane.b32.xlu0 %v1810_v9, %s2228_s24  ;;  %v1791_v9 = vadd.f32 %v4276_v59, %v1790_v29 }
 0x387   : > { %v1832_v62 = vmax.f32 %v1791_v9, 0.0 }
 0x38d   : > { %1885 = vrot.lane.b32.xlu0 %v1813_v11, %s2228_s24 }
 0x390   : > { %v1775_v31 = vpop.f32.mrf.mxu2 }
 0x391   : > { %v1776_v50 = vadd.f32 %v4276_v59, %v1775_v31 }
 0x393   : > { %v1827_v38 = vmax.f32 %v1776_v50, 0.0 }
 0x395   : > { %1891 = vrot.lane.b32.xlu0 %v1816_v61, %s2228_s24  ;;  %v1830_v61 = vmax.f32 %v1785_v56, 0.0 }
 0x397   : > { %v1872_v23 = vpop.permute.xlu2 %1871  ;;  %v1799_v11 = vpop.f32.mrf.mxu3 }
 0x398   : > { %1967 = vst.msk [vmem:[%s2303_s23 + $0x8] sm:$0xff] %vm1965_vm14, %v1872_v23  ;;  %v1751_v17 = vpop.f32.mrf.mxu1  ;;  %v1800_v37 = vadd.f32 %v4276_v59, %v1799_v11 }
 0x399   : > { %v1727_v3 = vpop.f32.mrf.mxu0  ;;  %v1752_v51 = vadd.f32 %v4276_v59, %v1751_v17 }
 0x39a   : > { %v1728_v26 = vadd.f32 %v4276_v59, %v1727_v3  ;;  %v1835_v18 = vmax.f32 %v1800_v37, 0.0 }
 0x39b   : > { %v1819_v7 = vmax.f32 %v1752_v51, 0.0 }
 0x39c   : > { %v1811_v45 = vmax.f32 %v1728_v26, 0.0 }
 0x39d   : > { %1897 = vrot.lane.b32.xlu0 %v1819_v7, %s2228_s24 }
 0x39e   : > { %1881 = vrot.lane.b32.xlu1 %v1811_v45, %s2228_s24 }
 0x3a5   : > { %1903 = vrot.lane.b32.xlu0 %v1822_v36, %s2228_s24 }
 0x3a6   : > { %1887 = vrot.lane.b32.xlu1 %v1814_v54, %s2228_s24  ;;  %v1778_v13 = vpop.f32.mrf.mxu2 }
 0x3a7   : > { %v1779_v0 = vadd.f32 %v4276_v59, %v1778_v13 }
 0x3a8   : > { %v1802_v23 = vpop.f32.mrf.mxu3 }
 0x3a9   : > { %v1828_v52 = vmax.f32 %v1779_v0, 0.0  ;;  %v1803_v17 = vadd.f32 %v4276_v59, %v1802_v23 }
 0x3aa   : > { %v1730_v44 = vpop.f32.mrf.mxu0 }
 0x3ab   : > { %v1731_v60 = vadd.f32 %v4276_v59, %v1730_v44  ;;  %v1836_v3 = vmax.f32 %v1803_v17, 0.0 }
 0x3ad   : > { %v1812_v41 = vmax.f32 %v1731_v60, 0.0  ;;  %1909 = vrot.lane.b32.xlu0 %v1825_v57, %s2228_s24 }
 0x3ae   : > { %1893 = vrot.lane.b32.xlu1 %v1817_v2, %s2228_s24 }
 0x3af   : > { %1883 = vrot.lane.b32.xlu2 %v1812_v41, %s2228_s24 }
 0x3b1   : > { %v1754_v12 = vpop.f32.mrf.mxu1 }
 0x3b2   : > { %v1755_v63 = vadd.f32 %v4276_v59, %v1754_v12 }
 0x3b4   : > { %v1820_v55 = vmax.f32 %v1755_v63, 0.0 }
 0x3b5   : > { %1915 = vrot.lane.b32.xlu0 %v1828_v52, %s2228_s24 }
 0x3b6   : > { %1899 = vrot.lane.b32.xlu1 %v1820_v55, %s2228_s24 }
 0x3b7   : > { %1889 = vrot.lane.b32.xlu2 %v1815_v42, %s2228_s24 }
 0x3bd   : > { %1921 = vrot.lane.b32.xlu0 %v1831_v1, %s2228_s24 }
 0x3be   : > { %1905 = vrot.lane.b32.xlu1 %v1823_v8, %s2228_s24 }
 0x3bf   : > { %1895 = vrot.lane.b32.xlu2 %v1818_v39, %s2228_s24  ;;  %v1874_v35 = vpop.permute.xlu0 %1873 }
 0x3c0   : > { %1968 = vst.msk [vmem:[%s2303_s23 + $0x10] sm:$0xff] %vm1965_vm14, %v1874_v35 }
 0x3c5   : > { %1927 = vrot.lane.b32.xlu0 %v1834_v5, %s2228_s24 }
 0x3c6   : > { %1911 = vrot.lane.b32.xlu1 %v1826_v14, %s2228_s24 }
 0x3c7   : > { %1901 = vrot.lane.b32.xlu2 %v1821_v30, %s2228_s24  ;;  %v1876_v19 = vpop.permute.xlu1 %1875 }
 0x3c8   : > { %1969 = vst.msk [vmem:[%s2303_s23 + $0x18] sm:$0xff] %vm1965_vm14, %v1876_v19 }
 0x3ce   : > { %1917 = vrot.lane.b32.xlu1 %v1829_v27, %s2228_s24 }
 0x3cf   : > { %1907 = vrot.lane.b32.xlu2 %v1824_v40, %s2228_s24  ;;  %v1878_v24 = vpop.permute.xlu2 %1877 }
 0x3d0   : > { %1970 = vst.msk [vmem:[%s2303_s23 + $0x20] sm:$0xff] %vm1965_vm14, %v1878_v24 }
 0x3d6   : > { %1923 = vrot.lane.b32.xlu1 %v1832_v62, %s2228_s24 }
 0x3d7   : > { %1913 = vrot.lane.b32.xlu2 %v1827_v38, %s2228_s24 }
 0x3de   : > { %1929 = vrot.lane.b32.xlu1 %v1835_v18, %s2228_s24 }
 0x3df   : > { %1919 = vrot.lane.b32.xlu2 %v1830_v61, %s2228_s24 }
 0x3e7   : > { %1925 = vrot.lane.b32.xlu2 %v1833_v25, %s2228_s24 }
 0x3ef   : > { %1931 = vrot.lane.b32.xlu2 %v1836_v3, %s2228_s24 }
 0x3f7   : > { %v1880_v51 = vpop.permute.xlu0 %1879 }
 0x3f8   : > { %1971 = vst.msk [vmem:[%s2303_s23 + $0x28] sm:$0xff] %vm1965_vm14, %v1880_v51 }
 0x3ff   : > { %v1886_v26 = vpop.permute.xlu0 %1885 }
 0x400   : > { %1974 = vst.msk [vmem:[%s2303_s23 + $0x40] sm:$0xff] %vm1965_vm14, %v1886_v26 }
 0x407   : > { %v1892_v7 = vpop.permute.xlu0 %1891 }
 0x408   : > { %1977 = vst.msk [vmem:[%s2303_s23 + $0x58] sm:$0xff] %vm1965_vm14, %v1892_v7 }
 0x409   : > { %v1884_v48 = vpop.permute.xlu2 %1883 }
 0x40a   : > { %1973 = vst.msk [vmem:[%s2303_s23 + $0x38] sm:$0xff] %vm1965_vm14, %v1884_v48 }
 0x40f   : > { %v1898_v59 = vpop.permute.xlu0 %1897 }
 0x410   : > { %v1882_v6 = vpop.permute.xlu1 %1881  ;;  %1980 = vst.msk [vmem:[%s2303_s23 + $0x70] sm:$0xff] %vm1965_vm14, %v1898_v59 }
 0x411   : > { %1972 = vst.msk [vmem:[%s2303_s23 + $0x30] sm:$0xff] %vm1965_vm14, %v1882_v6  ;;  %v1890_v45 = vpop.permute.xlu2 %1889 }
 0x412   : > { %1976 = vst.msk [vmem:[%s2303_s23 + $0x50] sm:$0xff] %vm1965_vm14, %v1890_v45 }
 0x417   : > { %v1904_v16 = vpop.permute.xlu0 %1903 }
 0x418   : > { %v1888_v21 = vpop.permute.xlu1 %1887  ;;  %1983 = vst.msk [vmem:[%s2303_s23 + $0x88] sm:$0xff] %vm1965_vm14, %v1904_v16 }
 0x419   : > { %1975 = vst.msk [vmem:[%s2303_s23 + $0x48] sm:$0xff] %vm1965_vm14, %v1888_v21  ;;  %v1896_v36 = vpop.permute.xlu2 %1895 }
 0x41a   : > { %1979 = vst.msk [vmem:[%s2303_s23 + $0x68] sm:$0xff] %vm1965_vm14, %v1896_v36 }
 0x41f   : > { %v1910_v54 = vpop.permute.xlu0 %1909 }
 0x420   : > { %v1894_v20 = vpop.permute.xlu1 %1893  ;;  %1986 = vst.msk [vmem:[%s2303_s23 + $0xa0] sm:$0xff] %vm1965_vm14, %v1910_v54 }
 0x421   : > { %1978 = vst.msk [vmem:[%s2303_s23 + $0x60] sm:$0xff] %vm1965_vm14, %v1894_v20  ;;  %v1902_v31 = vpop.permute.xlu2 %1901 }
 0x422   : > { %1982 = vst.msk [vmem:[%s2303_s23 + $0x80] sm:$0xff] %vm1965_vm14, %v1902_v31 }
 0x427   : > { %v1916_v47 = vpop.permute.xlu0 %1915 }
 0x428   : > { %v1900_v43 = vpop.permute.xlu1 %1899  ;;  %1989 = vst.msk [vmem:[%s2303_s23 + $0xb8] sm:$0xff] %vm1965_vm14, %v1916_v47 }
 0x429   : > { %1981 = vst.msk [vmem:[%s2303_s23 + $0x78] sm:$0xff] %vm1965_vm14, %v1900_v43  ;;  %v1908_v44 = vpop.permute.xlu2 %1907 }
 0x42a   : > { %1985 = vst.msk [vmem:[%s2303_s23 + $0x98] sm:$0xff] %vm1965_vm14, %v1908_v44 }
 0x42f   : > { %v1922_v57 = vpop.permute.xlu0 %1921 }
 0x430   : > { %v1906_v60 = vpop.permute.xlu1 %1905  ;;  %1992 = vst.msk [vmem:[%s2303_s23 + $0xd0] sm:$0xff] %vm1965_vm14, %v1922_v57 }
 0x431   : > { %1984 = vst.msk [vmem:[%s2303_s23 + $0x90] sm:$0xff] %vm1965_vm14, %v1906_v60  ;;  %v1914_v29 = vpop.permute.xlu2 %1913 }
 0x432   : > { %1988 = vst.msk [vmem:[%s2303_s23 + $0xb0] sm:$0xff] %vm1965_vm14, %v1914_v29 }
 0x437   : > { %v1928_v2 = vpop.permute.xlu0 %1927 }
 0x438   : > { %v1912_v13 = vpop.permute.xlu1 %1911  ;;  %1995 = vst.msk [vmem:[%s2303_s23 + $0xe8] sm:$0xff] %vm1965_vm14, %v1928_v2 }
 0x439   : > { %1987 = vst.msk [vmem:[%s2303_s23 + $0xa8] sm:$0xff] %vm1965_vm14, %v1912_v13  ;;  %v1920_v41 = vpop.permute.xlu2 %1919 }
 0x43a   : > { %1991 = vst.msk [vmem:[%s2303_s23 + $0xc8] sm:$0xff] %vm1965_vm14, %v1920_v41 }
 0x440   : > { %v1918_v0 = vpop.permute.xlu1 %1917 }
 0x441   : > { %1990 = vst.msk [vmem:[%s2303_s23 + $0xc0] sm:$0xff] %vm1965_vm14, %v1918_v0  ;;  %v1926_v28 = vpop.permute.xlu2 %1925 }
 0x442   : > { %1994 = vst.msk [vmem:[%s2303_s23 + $0xe0] sm:$0xff] %vm1965_vm14, %v1926_v28 }
 0x448   : > { %v1924_v12 = vpop.permute.xlu1 %1923 }
 0x449   : > { %1993 = vst.msk [vmem:[%s2303_s23 + $0xd8] sm:$0xff] %vm1965_vm14, %v1924_v12  ;;  %v1932_v63 = vpop.permute.xlu2 %1931 }
 0x44a   : > { %1997 = vst.msk [vmem:[%s2303_s23 + $0xf8] sm:$0xff] %vm1965_vm14, %v1932_v63 }
 0x450   : > { %v1930_v52 = vpop.permute.xlu1 %1929 }
 0x451   : > { %1996 = vst.msk [vmem:[%s2303_s23 + $0xf0] sm:$0xff] %vm1965_vm14, %v1930_v52 }
 0x452 PF: > { %s13_s14 = sadd.s32 1, %s2226_s14   ;;  %s5029_s12 = smov %s2222_s13 }
 0x453   : > { %p10_p5 = scmp.ge.s32.totalorder %s13_s14, 4   ;;  %s5030_s13 = smov %s5032_s15 }
 0x455   :  { %12 = sbr.rel (!%p10_p5) target bundleno = 2 (0x2), region = 62 }

</bundles_post_ra>
